<compile_context>
chip_gen: v7x
topology: tpu7x:2x2x1
jax: 0.10.0
libtpu: 0.0.40
codegen_flags: <defaults>
</compile_context>

<pallas_src>
import jax
import jax.numpy as jnp
from jax import lax
from jax.experimental import pallas as pl
from jax.experimental.pallas import tpu as pltpu


def _bidir_lstm_kernel(x_ref,        # (T*b, nIn)
                       wcat_ref,     # (nIn, 8H)  [wih_f.T | wih_b.T]
                       bcat_ref,     # (1, 8H)    folded LSTM biases, both dirs
                       whhf_ref,     # (H, 4H)
                       whhb_ref,     # (H, 4H)
                       wtop_ref,     # (H, nOut_pad)  forward half of emb weight
                       wbot_ref,     # (H, nOut_pad)  backward half
                       bemb_ref,     # (1, 1, nOut_pad)
                       out_ref,      # (T, b, nOut_pad)
                       g_ref):       # VMEM scratch (T*b, 8H)
    T, b, _ = out_ref.shape
    H = whhf_ref.shape[0]
    G4 = 4 * H

    # 1) Hoisted input projection for BOTH directions, biases folded in.
    #    One (T*b, nIn) @ (nIn, 8H) matmul instead of 2*T tiny matmuls inside the loop.
    g_ref[...] = (jnp.dot(x_ref[...], wcat_ref[...],
                          preferred_element_type=jnp.float32)
                  + bcat_ref[...])

    # 2) Initialize the output with the embedding bias (single lane-dense store);
    #    the recurrent loop then only accumulates h @ w_half into it.
    out_ref[...] = jnp.broadcast_to(bemb_ref[...], out_ref.shape)

    whh_f = whhf_ref[...]
    whh_b = whhb_ref[...]
    w_top = wtop_ref[...]
    w_bot = wbot_ref[...]

    def gates_to_hc(gates, c):
        # Full-width EUP passes over all 4H gate lanes, then slice (PyTorch order i,f,g,o).
        sg = jax.nn.sigmoid(gates)
        th = jnp.tanh(gates)
        i = sg[:, 0 * H:1 * H]
        f = sg[:, 1 * H:2 * H]
        g = th[:, 2 * H:3 * H]
        o = sg[:, 3 * H:4 * H]
        c_new = f * c + i * g
        h_new = o * jnp.tanh(c_new)
        return h_new, c_new

    def body(s, carry):
        h_f, c_f, h_b, c_b = carry
        tf = s            # forward timestep
        tb = T - 1 - s    # backward timestep

        # Precomputed input-gate blocks (biases already included).
        gin_f = g_ref[pl.ds(tf * b, b), :][:, :G4]
        gin_b = g_ref[pl.ds(tb * b, b), :][:, G4:]

        # Two independent recurrent matmuls — interleaved chains overlap on MXU/EUP.
        gates_f = gin_f + jnp.dot(h_f, whh_f, preferred_element_type=jnp.float32)
        gates_b = gin_b + jnp.dot(h_b, whh_b, preferred_element_type=jnp.float32)

        h_f, c_f = gates_to_hc(gates_f, c_f)
        h_b, c_b = gates_to_hc(gates_b, c_b)

        # Fused output projection (accumulate each direction's half-contribution).
        out_ref[tf] = out_ref[tf] + jnp.dot(h_f, w_top,
                                            preferred_element_type=jnp.float32)
        out_ref[tb] = out_ref[tb] + jnp.dot(h_b, w_bot,
                                            preferred_element_type=jnp.float32)
        return (h_f, c_f, h_b, c_b)

    z = jnp.zeros((b, H), jnp.float32)
    lax.fori_loop(0, T, body, (z, z, z, z), unroll=True)


def bidirectional_lstm(x, params):
    """x: (T, b, nIn) float32; params in raw PyTorch layout (see init_params)."""
    T, b, nIn = x.shape
    H = params["whh_f"].shape[1]
    nOut = params["wemb"].shape[0]
    nOut_pad = ((nOut + 127) // 128) * 128   # lane-dense output stores
    pad = nOut_pad - nOut

    # --- weight prep (cheap, outside the kernel) ---
    x2d = x.reshape(T * b, nIn)
    wcat = jnp.concatenate([params["wih_f"].T, params["wih_b"].T], axis=1)   # (nIn, 8H)
    bcat = jnp.concatenate([params["bih_f"] + params["bhh_f"],
                            params["bih_b"] + params["bhh_b"]], axis=0)[None, :]  # (1, 8H)
    whh_f_t = params["whh_f"].T                                              # (H, 4H)
    whh_b_t = params["whh_b"].T
    wemb_t = params["wemb"].T                                                # (2H, nOut)
    w_top = jnp.pad(wemb_t[:H], ((0, 0), (0, pad)))                          # (H, nOut_pad)
    w_bot = jnp.pad(wemb_t[H:], ((0, 0), (0, pad)))
    bemb = jnp.pad(params["bemb"], (0, pad)).reshape(1, 1, nOut_pad)

    def full(shape):
        return pl.BlockSpec(shape, lambda i, n=len(shape): (0,) * n)

    args = (x2d, wcat, bcat, whh_f_t, whh_b_t, w_top, w_bot, bemb)
    out_padded = pl.pallas_call(
        _bidir_lstm_kernel,
        out_shape=jax.ShapeDtypeStruct((T, b, nOut_pad), jnp.float32),
        grid=(1,),
        in_specs=[full(a.shape) for a in args],
        out_specs=full((T, b, nOut_pad)),
        scratch_shapes=[pltpu.VMEM((T * b, 8 * H), jnp.float32)],
        compiler_params=pltpu.CompilerParams(
            dimension_semantics=("arbitrary",)),
    )(*args)
    return out_padded[..., :nOut]


def init_params(key, nIn, nHidden, nOut):
    """Raw PyTorch-layout parameters for nn.LSTM(bidirectional=True) + nn.Linear."""
    H = nHidden
    k = 1.0 / float(H) ** 0.5
    ke = 1.0 / float(2 * H) ** 0.5
    keys = jax.random.split(key, 10)
    u = lambda kk, shape, s: jax.random.uniform(kk, shape, jnp.float32, -s, s)
    return dict(
        wih_f=u(keys[0], (4 * H, nIn), k), whh_f=u(keys[1], (4 * H, H), k),
        bih_f=u(keys[2], (4 * H,), k),     bhh_f=u(keys[3], (4 * H,), k),
        wih_b=u(keys[4], (4 * H, nIn), k), whh_b=u(keys[5], (4 * H, H), k),
        bih_b=u(keys[6], (4 * H,), k),     bhh_b=u(keys[7], (4 * H,), k),
        wemb=u(keys[8], (nOut, 2 * H), ke), bemb=u(keys[9], (nOut,), ke),
    )


def reference(x, p):
    """Plain-JAX reference with PyTorch nn.LSTM + nn.Linear semantics."""
    T, b, _ = x.shape
    H = p["whh_f"].shape[1]

    def run_dir(wih, whh, bih, bhh, xs):
        wih_t, whh_t, bias = wih.T, whh.T, (bih + bhh)[None, :]

        def step(carry, x_t):
            h, c = carry
            gates = x_t @ wih_t + h @ whh_t + bias
            i = jax.nn.sigmoid(gates[:, :H])
            f = jax.nn.sigmoid(gates[:, H:2 * H])
            g = jnp.tanh(gates[:, 2 * H:3 * H])
            o = jax.nn.sigmoid(gates[:, 3 * H:])
            c = f * c + i * g
            h = o * jnp.tanh(c)
            return (h, c), h

        init = (jnp.zeros((b, H), jnp.float32), jnp.zeros((b, H), jnp.float32))
        _, hs = lax.scan(step, init, xs)
        return hs

    hs_f = run_dir(p["wih_f"], p["whh_f"], p["bih_f"], p["bhh_f"], x)
    hs_b = run_dir(p["wih_b"], p["whh_b"], p["bih_b"], p["bhh_b"], x[::-1])[::-1]
    rec = jnp.concatenate([hs_f, hs_b], axis=-1)             # (T, b, 2H)
    out = rec.reshape(T * b, 2 * H) @ p["wemb"].T + p["bemb"][None, :]
    return out.reshape(T, b, -1)


if __name__ == "__main__":
    T, batch, nIn, nHidden, nOut = 8, 2, 32, 32, 16
    key = jax.random.PRNGKey(0)
    kx, kp = jax.random.split(key)
    x = jax.random.normal(kx, (T, batch, nIn), jnp.float32)
    params = init_params(kp, nIn, nHidden, nOut)

    out = jax.block_until_ready(bidirectional_lstm(x, params))
    ref = jax.block_until_ready(reference(x, params))

    assert out.shape == (T, batch, nOut)
    assert jnp.allclose(out, ref, rtol=1e-2, atol=1e-2), "mismatch vs reference"
    print("KERNEL_OK")
</pallas_src>

<mosaic_0001>
module attributes {stable_mosaic.version = 11 : i64} {
  func.func @_bidir_lstm_kernel(%arg0: i32, %arg1: memref<16x32xf32, #tpu.memory_space<vmem>>, %arg2: memref<32x256xf32, #tpu.memory_space<vmem>>, %arg3: memref<1x256xf32, #tpu.memory_space<vmem>>, %arg4: memref<32x128xf32, #tpu.memory_space<vmem>>, %arg5: memref<32x128xf32, #tpu.memory_space<vmem>>, %arg6: memref<32x128xf32, #tpu.memory_space<vmem>>, %arg7: memref<32x128xf32, #tpu.memory_space<vmem>>, %arg8: memref<1x1x128xf32, #tpu.memory_space<vmem>>, %arg9: memref<8x2x128xf32, #tpu.memory_space<vmem>>, %arg10: memref<16x256xf32, #tpu.memory_space<vmem>>) attributes {dimension_semantics = [#tpu.dimension_semantics<arbitrary>], iteration_bounds = array<i64: 1>, scalar_prefetch = 0 : i64, scratch_operands = 1 : i64, tpu.core_type = #tpu.core_type<tc>, window_params = [{pipeline_mode = #tpu.pipeline_mode<synchronous>, transform_indices = @transform_0, window_bounds = array<i64: 16, 32>}, {pipeline_mode = #tpu.pipeline_mode<synchronous>, transform_indices = @transform_1, window_bounds = array<i64: 32, 256>}, {pipeline_mode = #tpu.pipeline_mode<synchronous>, transform_indices = @transform_2, window_bounds = array<i64: 1, 256>}, {pipeline_mode = #tpu.pipeline_mode<synchronous>, transform_indices = @transform_3, window_bounds = array<i64: 32, 128>}, {pipeline_mode = #tpu.pipeline_mode<synchronous>, transform_indices = @transform_4, window_bounds = array<i64: 32, 128>}, {pipeline_mode = #tpu.pipeline_mode<synchronous>, transform_indices = @transform_5, window_bounds = array<i64: 32, 128>}, {pipeline_mode = #tpu.pipeline_mode<synchronous>, transform_indices = @transform_6, window_bounds = array<i64: 32, 128>}, {pipeline_mode = #tpu.pipeline_mode<synchronous>, transform_indices = @transform_7, window_bounds = array<i64: 1, 1, 128>}, {pipeline_mode = #tpu.pipeline_mode<synchronous>, transform_indices = @transform_8, window_bounds = array<i64: 8, 2, 128>}]} {
    %c0 = arith.constant 0 : index
    %c0_0 = arith.constant 0 : index
    %0 = vector.load %arg1[%c0, %c0_0] : memref<16x32xf32, #tpu.memory_space<vmem>>, vector<16x32xf32>
    %c0_1 = arith.constant 0 : index
    %c0_2 = arith.constant 0 : index
    %1 = vector.load %arg2[%c0_1, %c0_2] : memref<32x256xf32, #tpu.memory_space<vmem>>, vector<32x256xf32>
    %cst = arith.constant dense<0.000000e+00> : vector<16x256xf32>
    %2 = tpu.matmul %0, %1, %cst {dimension_numbers = #tpu.dot_dimension_numbers<[1], [0], [0], [1], [0, 0, 1, 1], [], []>} : vector<16x32xf32>, vector<32x256xf32>, vector<16x256xf32> -> vector<16x256xf32>
    %c0_3 = arith.constant 0 : index
    %c0_4 = arith.constant 0 : index
    %3 = vector.load %arg3[%c0_3, %c0_4] : memref<1x256xf32, #tpu.memory_space<vmem>>, vector<1x256xf32>
    %4 = vector.broadcast %3 : vector<1x256xf32> to vector<16x256xf32>
    %5 = arith.addf %2, %4 : vector<16x256xf32>
    %c0_5 = arith.constant 0 : index
    %c0_6 = arith.constant 0 : index
    %6 = vector.load %arg10[%c0_5, %c0_6] : memref<16x256xf32, #tpu.memory_space<vmem>>, vector<16x256xf32>
    tpu.vector_store %arg10[%c0_5, %c0_6], %5 {strides = array<i32>} : memref<16x256xf32, #tpu.memory_space<vmem>>, vector<16x256xf32>,
    %c0_7 = arith.constant 0 : index
    %c0_8 = arith.constant 0 : index
    %c0_9 = arith.constant 0 : index
    %7 = vector.load %arg8[%c0_7, %c0_8, %c0_9] : memref<1x1x128xf32, #tpu.memory_space<vmem>>, vector<1x1x128xf32>
    %8 = vector.shape_cast %7 : vector<1x1x128xf32> to vector<1x1x128xf32>
    %9 = vector.broadcast %8 : vector<1x1x128xf32> to vector<8x2x128xf32>
    %c0_10 = arith.constant 0 : index
    %c0_11 = arith.constant 0 : index
    %c0_12 = arith.constant 0 : index
    %10 = vector.load %arg9[%c0_10, %c0_11, %c0_12] : memref<8x2x128xf32, #tpu.memory_space<vmem>>, vector<8x2x128xf32>
    tpu.vector_store %arg9[%c0_10, %c0_11, %c0_12], %9 {strides = array<i32>} : memref<8x2x128xf32, #tpu.memory_space<vmem>>, vector<8x2x128xf32>,
    %c0_13 = arith.constant 0 : index
    %c0_14 = arith.constant 0 : index
    %11 = vector.load %arg4[%c0_13, %c0_14] : memref<32x128xf32, #tpu.memory_space<vmem>>, vector<32x128xf32>
    %c0_15 = arith.constant 0 : index
    %c0_16 = arith.constant 0 : index
    %12 = vector.load %arg5[%c0_15, %c0_16] : memref<32x128xf32, #tpu.memory_space<vmem>>, vector<32x128xf32>
    %c0_17 = arith.constant 0 : index
    %c0_18 = arith.constant 0 : index
    %13 = vector.load %arg6[%c0_17, %c0_18] : memref<32x128xf32, #tpu.memory_space<vmem>>, vector<32x128xf32>
    %c0_19 = arith.constant 0 : index
    %c0_20 = arith.constant 0 : index
    %14 = vector.load %arg7[%c0_19, %c0_20] : memref<32x128xf32, #tpu.memory_space<vmem>>, vector<32x128xf32>
    %cst_21 = arith.constant 0.000000e+00 : f32
    %15 = vector.broadcast %cst_21 : f32 to vector<2x32xf32>
    %c0_i32 = arith.constant 0 : i32
    %c7_i32 = arith.constant 7 : i32
    %16 = arith.subi %c7_i32, %c0_i32 : i32
    %c2_i32 = arith.constant 2 : i32
    %17 = arith.muli %c0_i32, %c2_i32 : i32
    %18 = arith.index_cast %17 : i32 to index
    %c0_22 = arith.constant 0 : index
    %19 = vector.load %arg10[%18, %c0_22] : memref<16x256xf32, #tpu.memory_space<vmem>>, vector<2x256xf32>
    %20 = vector.extract_strided_slice %19 {offsets = [0, 0], sizes = [2, 128], strides = [1, 1]} : vector<2x256xf32> to vector<2x128xf32>
    %c2_i32_23 = arith.constant 2 : i32
    %21 = arith.muli %16, %c2_i32_23 : i32
    %22 = arith.index_cast %21 : i32 to index
    %c0_24 = arith.constant 0 : index
    %23 = vector.load %arg10[%22, %c0_24] : memref<16x256xf32, #tpu.memory_space<vmem>>, vector<2x256xf32>
    %24 = vector.extract_strided_slice %23 {offsets = [0, 128], sizes = [2, 128], strides = [1, 1]} : vector<2x256xf32> to vector<2x128xf32>
    %cst_25 = arith.constant dense<0.000000e+00> : vector<2x128xf32>
    %25 = tpu.matmul %15, %11, %cst_25 {dimension_numbers = #tpu.dot_dimension_numbers<[1], [0], [0], [1], [0, 0, 1, 1], [], []>} : vector<2x32xf32>, vector<32x128xf32>, vector<2x128xf32> -> vector<2x128xf32>
    %26 = arith.addf %20, %25 : vector<2x128xf32>
    %cst_26 = arith.constant dense<0.000000e+00> : vector<2x128xf32>
    %27 = tpu.matmul %15, %12, %cst_26 {dimension_numbers = #tpu.dot_dimension_numbers<[1], [0], [0], [1], [0, 0, 1, 1], [], []>} : vector<2x32xf32>, vector<32x128xf32>, vector<2x128xf32> -> vector<2x128xf32>
    %28 = arith.addf %24, %27 : vector<2x128xf32>
    %29 = arith.negf %26 : vector<2x128xf32>
    %30 = math.exp %29 : vector<2x128xf32>
    %cst_27 = arith.constant 1.000000e+00 : f32
    %31 = vector.broadcast %cst_27 : f32 to vector<2x128xf32>
    %32 = arith.addf %31, %30 : vector<2x128xf32>
    %33 = arith.divf %31, %32 : vector<2x128xf32>
    %34 = math.tanh %26 : vector<2x128xf32>
    %35 = vector.extract_strided_slice %33 {offsets = [0, 0], sizes = [2, 32], strides = [1, 1]} : vector<2x128xf32> to vector<2x32xf32>
    %36 = vector.extract_strided_slice %33 {offsets = [0, 32], sizes = [2, 32], strides = [1, 1]} : vector<2x128xf32> to vector<2x32xf32>
    %37 = vector.extract_strided_slice %34 {offsets = [0, 64], sizes = [2, 32], strides = [1, 1]} : vector<2x128xf32> to vector<2x32xf32>
    %38 = vector.extract_strided_slice %33 {offsets = [0, 96], sizes = [2, 32], strides = [1, 1]} : vector<2x128xf32> to vector<2x32xf32>
    %39 = arith.mulf %36, %15 : vector<2x32xf32>
    %40 = arith.mulf %35, %37 : vector<2x32xf32>
    %41 = arith.addf %39, %40 : vector<2x32xf32>
    %42 = math.tanh %41 : vector<2x32xf32>
    %43 = arith.mulf %38, %42 : vector<2x32xf32>
    %44 = arith.negf %28 : vector<2x128xf32>
    %45 = math.exp %44 : vector<2x128xf32>
    %cst_28 = arith.constant 1.000000e+00 : f32
    %46 = vector.broadcast %cst_28 : f32 to vector<2x128xf32>
    %47 = arith.addf %46, %45 : vector<2x128xf32>
    %48 = arith.divf %46, %47 : vector<2x128xf32>
    %49 = math.tanh %28 : vector<2x128xf32>
    %50 = vector.extract_strided_slice %48 {offsets = [0, 0], sizes = [2, 32], strides = [1, 1]} : vector<2x128xf32> to vector<2x32xf32>
    %51 = vector.extract_strided_slice %48 {offsets = [0, 32], sizes = [2, 32], strides = [1, 1]} : vector<2x128xf32> to vector<2x32xf32>
    %52 = vector.extract_strided_slice %49 {offsets = [0, 64], sizes = [2, 32], strides = [1, 1]} : vector<2x128xf32> to vector<2x32xf32>
    %53 = vector.extract_strided_slice %48 {offsets = [0, 96], sizes = [2, 32], strides = [1, 1]} : vector<2x128xf32> to vector<2x32xf32>
    %54 = arith.mulf %51, %15 : vector<2x32xf32>
    %55 = arith.mulf %50, %52 : vector<2x32xf32>
    %56 = arith.addf %54, %55 : vector<2x32xf32>
    %57 = math.tanh %56 : vector<2x32xf32>
    %58 = arith.mulf %53, %57 : vector<2x32xf32>
    %59 = arith.index_cast %c0_i32 : i32 to index
    %c0_29 = arith.constant 0 : index
    %c0_30 = arith.constant 0 : index
    %60 = vector.load %arg9[%59, %c0_29, %c0_30] : memref<8x2x128xf32, #tpu.memory_space<vmem>>, vector<1x2x128xf32>
    %61 = vector.shape_cast %60 : vector<1x2x128xf32> to vector<2x128xf32>
    %cst_31 = arith.constant dense<0.000000e+00> : vector<2x128xf32>
    %62 = tpu.matmul %43, %13, %cst_31 {dimension_numbers = #tpu.dot_dimension_numbers<[1], [0], [0], [1], [0, 0, 1, 1], [], []>} : vector<2x32xf32>, vector<32x128xf32>, vector<2x128xf32> -> vector<2x128xf32>
    %63 = arith.addf %61, %62 : vector<2x128xf32>
    %64 = arith.index_cast %c0_i32 : i32 to index
    %c0_32 = arith.constant 0 : index
    %c0_33 = arith.constant 0 : index
    %65 = vector.load %arg9[%64, %c0_32, %c0_33] : memref<8x2x128xf32, #tpu.memory_space<vmem>>, vector<1x2x128xf32>
    %66 = vector.shape_cast %65 : vector<1x2x128xf32> to vector<2x128xf32>
    %67 = vector.shape_cast %63 : vector<2x128xf32> to vector<1x2x128xf32>
    tpu.vector_store %arg9[%64, %c0_32, %c0_33], %67 {strides = array<i32>} : memref<8x2x128xf32, #tpu.memory_space<vmem>>, vector<1x2x128xf32>,
    %68 = arith.index_cast %16 : i32 to index
    %c0_34 = arith.constant 0 : index
    %c0_35 = arith.constant 0 : index
    %69 = vector.load %arg9[%68, %c0_34, %c0_35] : memref<8x2x128xf32, #tpu.memory_space<vmem>>, vector<1x2x128xf32>
    %70 = vector.shape_cast %69 : vector<1x2x128xf32> to vector<2x128xf32>
    %cst_36 = arith.constant dense<0.000000e+00> : vector<2x128xf32>
    %71 = tpu.matmul %58, %14, %cst_36 {dimension_numbers = #tpu.dot_dimension_numbers<[1], [0], [0], [1], [0, 0, 1, 1], [], []>} : vector<2x32xf32>, vector<32x128xf32>, vector<2x128xf32> -> vector<2x128xf32>
    %72 = arith.addf %70, %71 : vector<2x128xf32>
    %73 = arith.index_cast %16 : i32 to index
    %c0_37 = arith.constant 0 : index
    %c0_38 = arith.constant 0 : index
    %74 = vector.load %arg9[%73, %c0_37, %c0_38] : memref<8x2x128xf32, #tpu.memory_space<vmem>>, vector<1x2x128xf32>
    %75 = vector.shape_cast %74 : vector<1x2x128xf32> to vector<2x128xf32>
    %76 = vector.shape_cast %72 : vector<2x128xf32> to vector<1x2x128xf32>
    tpu.vector_store %arg9[%73, %c0_37, %c0_38], %76 {strides = array<i32>} : memref<8x2x128xf32, #tpu.memory_space<vmem>>, vector<1x2x128xf32>,
    %c1_i32 = arith.constant 1 : i32
    %c7_i32_39 = arith.constant 7 : i32
    %77 = arith.subi %c7_i32_39, %c1_i32 : i32
    %c2_i32_40 = arith.constant 2 : i32
    %78 = arith.muli %c1_i32, %c2_i32_40 : i32
    %79 = arith.index_cast %78 : i32 to index
    %c0_41 = arith.constant 0 : index
    %80 = vector.load %arg10[%79, %c0_41] : memref<16x256xf32, #tpu.memory_space<vmem>>, vector<2x256xf32>
    %81 = vector.extract_strided_slice %80 {offsets = [0, 0], sizes = [2, 128], strides = [1, 1]} : vector<2x256xf32> to vector<2x128xf32>
    %c2_i32_42 = arith.constant 2 : i32
    %82 = arith.muli %77, %c2_i32_42 : i32
    %83 = arith.index_cast %82 : i32 to index
    %c0_43 = arith.constant 0 : index
    %84 = vector.load %arg10[%83, %c0_43] : memref<16x256xf32, #tpu.memory_space<vmem>>, vector<2x256xf32>
    %85 = vector.extract_strided_slice %84 {offsets = [0, 128], sizes = [2, 128], strides = [1, 1]} : vector<2x256xf32> to vector<2x128xf32>
    %cst_44 = arith.constant dense<0.000000e+00> : vector<2x128xf32>
    %86 = tpu.matmul %43, %11, %cst_44 {dimension_numbers = #tpu.dot_dimension_numbers<[1], [0], [0], [1], [0, 0, 1, 1], [], []>} : vector<2x32xf32>, vector<32x128xf32>, vector<2x128xf32> -> vector<2x128xf32>
    %87 = arith.addf %81, %86 : vector<2x128xf32>
    %cst_45 = arith.constant dense<0.000000e+00> : vector<2x128xf32>
    %88 = tpu.matmul %58, %12, %cst_45 {dimension_numbers = #tpu.dot_dimension_numbers<[1], [0], [0], [1], [0, 0, 1, 1], [], []>} : vector<2x32xf32>, vector<32x128xf32>, vector<2x128xf32> -> vector<2x128xf32>
    %89 = arith.addf %85, %88 : vector<2x128xf32>
    %90 = arith.negf %87 : vector<2x128xf32>
    %91 = math.exp %90 : vector<2x128xf32>
    %cst_46 = arith.constant 1.000000e+00 : f32
    %92 = vector.broadcast %cst_46 : f32 to vector<2x128xf32>
    %93 = arith.addf %92, %91 : vector<2x128xf32>
    %94 = arith.divf %92, %93 : vector<2x128xf32>
    %95 = math.tanh %87 : vector<2x128xf32>
    %96 = vector.extract_strided_slice %94 {offsets = [0, 0], sizes = [2, 32], strides = [1, 1]} : vector<2x128xf32> to vector<2x32xf32>
    %97 = vector.extract_strided_slice %94 {offsets = [0, 32], sizes = [2, 32], strides = [1, 1]} : vector<2x128xf32> to vector<2x32xf32>
    %98 = vector.extract_strided_slice %95 {offsets = [0, 64], sizes = [2, 32], strides = [1, 1]} : vector<2x128xf32> to vector<2x32xf32>
    %99 = vector.extract_strided_slice %94 {offsets = [0, 96], sizes = [2, 32], strides = [1, 1]} : vector<2x128xf32> to vector<2x32xf32>
    %100 = arith.mulf %97, %41 : vector<2x32xf32>
    %101 = arith.mulf %96, %98 : vector<2x32xf32>
    %102 = arith.addf %100, %101 : vector<2x32xf32>
    %103 = math.tanh %102 : vector<2x32xf32>
    %104 = arith.mulf %99, %103 : vector<2x32xf32>
    %105 = arith.negf %89 : vector<2x128xf32>
    %106 = math.exp %105 : vector<2x128xf32>
    %cst_47 = arith.constant 1.000000e+00 : f32
    %107 = vector.broadcast %cst_47 : f32 to vector<2x128xf32>
    %108 = arith.addf %107, %106 : vector<2x128xf32>
    %109 = arith.divf %107, %108 : vector<2x128xf32>
    %110 = math.tanh %89 : vector<2x128xf32>
    %111 = vector.extract_strided_slice %109 {offsets = [0, 0], sizes = [2, 32], strides = [1, 1]} : vector<2x128xf32> to vector<2x32xf32>
    %112 = vector.extract_strided_slice %109 {offsets = [0, 32], sizes = [2, 32], strides = [1, 1]} : vector<2x128xf32> to vector<2x32xf32>
    %113 = vector.extract_strided_slice %110 {offsets = [0, 64], sizes = [2, 32], strides = [1, 1]} : vector<2x128xf32> to vector<2x32xf32>
    %114 = vector.extract_strided_slice %109 {offsets = [0, 96], sizes = [2, 32], strides = [1, 1]} : vector<2x128xf32> to vector<2x32xf32>
    %115 = arith.mulf %112, %56 : vector<2x32xf32>
    %116 = arith.mulf %111, %113 : vector<2x32xf32>
    %117 = arith.addf %115, %116 : vector<2x32xf32>
    %118 = math.tanh %117 : vector<2x32xf32>
    %119 = arith.mulf %114, %118 : vector<2x32xf32>
    %120 = arith.index_cast %c1_i32 : i32 to index
    %c0_48 = arith.constant 0 : index
    %c0_49 = arith.constant 0 : index
    %121 = vector.load %arg9[%120, %c0_48, %c0_49] : memref<8x2x128xf32, #tpu.memory_space<vmem>>, vector<1x2x128xf32>
    %122 = vector.shape_cast %121 : vector<1x2x128xf32> to vector<2x128xf32>
    %cst_50 = arith.constant dense<0.000000e+00> : vector<2x128xf32>
    %123 = tpu.matmul %104, %13, %cst_50 {dimension_numbers = #tpu.dot_dimension_numbers<[1], [0], [0], [1], [0, 0, 1, 1], [], []>} : vector<2x32xf32>, vector<32x128xf32>, vector<2x128xf32> -> vector<2x128xf32>
    %124 = arith.addf %122, %123 : vector<2x128xf32>
    %125 = arith.index_cast %c1_i32 : i32 to index
    %c0_51 = arith.constant 0 : index
    %c0_52 = arith.constant 0 : index
    %126 = vector.load %arg9[%125, %c0_51, %c0_52] : memref<8x2x128xf32, #tpu.memory_space<vmem>>, vector<1x2x128xf32>
    %127 = vector.shape_cast %126 : vector<1x2x128xf32> to vector<2x128xf32>
    %128 = vector.shape_cast %124 : vector<2x128xf32> to vector<1x2x128xf32>
    tpu.vector_store %arg9[%125, %c0_51, %c0_52], %128 {strides = array<i32>} : memref<8x2x128xf32, #tpu.memory_space<vmem>>, vector<1x2x128xf32>,
    %129 = arith.index_cast %77 : i32 to index
    %c0_53 = arith.constant 0 : index
    %c0_54 = arith.constant 0 : index
    %130 = vector.load %arg9[%129, %c0_53, %c0_54] : memref<8x2x128xf32, #tpu.memory_space<vmem>>, vector<1x2x128xf32>
    %131 = vector.shape_cast %130 : vector<1x2x128xf32> to vector<2x128xf32>
    %cst_55 = arith.constant dense<0.000000e+00> : vector<2x128xf32>
    %132 = tpu.matmul %119, %14, %cst_55 {dimension_numbers = #tpu.dot_dimension_numbers<[1], [0], [0], [1], [0, 0, 1, 1], [], []>} : vector<2x32xf32>, vector<32x128xf32>, vector<2x128xf32> -> vector<2x128xf32>
    %133 = arith.addf %131, %132 : vector<2x128xf32>
    %134 = arith.index_cast %77 : i32 to index
    %c0_56 = arith.constant 0 : index
    %c0_57 = arith.constant 0 : index
    %135 = vector.load %arg9[%134, %c0_56, %c0_57] : memref<8x2x128xf32, #tpu.memory_space<vmem>>, vector<1x2x128xf32>
    %136 = vector.shape_cast %135 : vector<1x2x128xf32> to vector<2x128xf32>
    %137 = vector.shape_cast %133 : vector<2x128xf32> to vector<1x2x128xf32>
    tpu.vector_store %arg9[%134, %c0_56, %c0_57], %137 {strides = array<i32>} : memref<8x2x128xf32, #tpu.memory_space<vmem>>, vector<1x2x128xf32>,
    %c2_i32_58 = arith.constant 2 : i32
    %c7_i32_59 = arith.constant 7 : i32
    %138 = arith.subi %c7_i32_59, %c2_i32_58 : i32
    %c2_i32_60 = arith.constant 2 : i32
    %139 = arith.muli %c2_i32_58, %c2_i32_60 : i32
    %140 = arith.index_cast %139 : i32 to index
    %c0_61 = arith.constant 0 : index
    %141 = vector.load %arg10[%140, %c0_61] : memref<16x256xf32, #tpu.memory_space<vmem>>, vector<2x256xf32>
    %142 = vector.extract_strided_slice %141 {offsets = [0, 0], sizes = [2, 128], strides = [1, 1]} : vector<2x256xf32> to vector<2x128xf32>
    %c2_i32_62 = arith.constant 2 : i32
    %143 = arith.muli %138, %c2_i32_62 : i32
    %144 = arith.index_cast %143 : i32 to index
    %c0_63 = arith.constant 0 : index
    %145 = vector.load %arg10[%144, %c0_63] : memref<16x256xf32, #tpu.memory_space<vmem>>, vector<2x256xf32>
    %146 = vector.extract_strided_slice %145 {offsets = [0, 128], sizes = [2, 128], strides = [1, 1]} : vector<2x256xf32> to vector<2x128xf32>
    %cst_64 = arith.constant dense<0.000000e+00> : vector<2x128xf32>
    %147 = tpu.matmul %104, %11, %cst_64 {dimension_numbers = #tpu.dot_dimension_numbers<[1], [0], [0], [1], [0, 0, 1, 1], [], []>} : vector<2x32xf32>, vector<32x128xf32>, vector<2x128xf32> -> vector<2x128xf32>
    %148 = arith.addf %142, %147 : vector<2x128xf32>
    %cst_65 = arith.constant dense<0.000000e+00> : vector<2x128xf32>
    %149 = tpu.matmul %119, %12, %cst_65 {dimension_numbers = #tpu.dot_dimension_numbers<[1], [0], [0], [1], [0, 0, 1, 1], [], []>} : vector<2x32xf32>, vector<32x128xf32>, vector<2x128xf32> -> vector<2x128xf32>
    %150 = arith.addf %146, %149 : vector<2x128xf32>
    %151 = arith.negf %148 : vector<2x128xf32>
    %152 = math.exp %151 : vector<2x128xf32>
    %cst_66 = arith.constant 1.000000e+00 : f32
    %153 = vector.broadcast %cst_66 : f32 to vector<2x128xf32>
    %154 = arith.addf %153, %152 : vector<2x128xf32>
    %155 = arith.divf %153, %154 : vector<2x128xf32>
    %156 = math.tanh %148 : vector<2x128xf32>
    %157 = vector.extract_strided_slice %155 {offsets = [0, 0], sizes = [2, 32], strides = [1, 1]} : vector<2x128xf32> to vector<2x32xf32>
    %158 = vector.extract_strided_slice %155 {offsets = [0, 32], sizes = [2, 32], strides = [1, 1]} : vector<2x128xf32> to vector<2x32xf32>
    %159 = vector.extract_strided_slice %156 {offsets = [0, 64], sizes = [2, 32], strides = [1, 1]} : vector<2x128xf32> to vector<2x32xf32>
    %160 = vector.extract_strided_slice %155 {offsets = [0, 96], sizes = [2, 32], strides = [1, 1]} : vector<2x128xf32> to vector<2x32xf32>
    %161 = arith.mulf %158, %102 : vector<2x32xf32>
    %162 = arith.mulf %157, %159 : vector<2x32xf32>
    %163 = arith.addf %161, %162 : vector<2x32xf32>
    %164 = math.tanh %163 : vector<2x32xf32>
    %165 = arith.mulf %160, %164 : vector<2x32xf32>
    %166 = arith.negf %150 : vector<2x128xf32>
    %167 = math.exp %166 : vector<2x128xf32>
    %cst_67 = arith.constant 1.000000e+00 : f32
    %168 = vector.broadcast %cst_67 : f32 to vector<2x128xf32>
    %169 = arith.addf %168, %167 : vector<2x128xf32>
    %170 = arith.divf %168, %169 : vector<2x128xf32>
    %171 = math.tanh %150 : vector<2x128xf32>
    %172 = vector.extract_strided_slice %170 {offsets = [0, 0], sizes = [2, 32], strides = [1, 1]} : vector<2x128xf32> to vector<2x32xf32>
    %173 = vector.extract_strided_slice %170 {offsets = [0, 32], sizes = [2, 32], strides = [1, 1]} : vector<2x128xf32> to vector<2x32xf32>
    %174 = vector.extract_strided_slice %171 {offsets = [0, 64], sizes = [2, 32], strides = [1, 1]} : vector<2x128xf32> to vector<2x32xf32>
    %175 = vector.extract_strided_slice %170 {offsets = [0, 96], sizes = [2, 32], strides = [1, 1]} : vector<2x128xf32> to vector<2x32xf32>
    %176 = arith.mulf %173, %117 : vector<2x32xf32>
    %177 = arith.mulf %172, %174 : vector<2x32xf32>
    %178 = arith.addf %176, %177 : vector<2x32xf32>
    %179 = math.tanh %178 : vector<2x32xf32>
    %180 = arith.mulf %175, %179 : vector<2x32xf32>
    %181 = arith.index_cast %c2_i32_58 : i32 to index
    %c0_68 = arith.constant 0 : index
    %c0_69 = arith.constant 0 : index
    %182 = vector.load %arg9[%181, %c0_68, %c0_69] : memref<8x2x128xf32, #tpu.memory_space<vmem>>, vector<1x2x128xf32>
    %183 = vector.shape_cast %182 : vector<1x2x128xf32> to vector<2x128xf32>
    %cst_70 = arith.constant dense<0.000000e+00> : vector<2x128xf32>
    %184 = tpu.matmul %165, %13, %cst_70 {dimension_numbers = #tpu.dot_dimension_numbers<[1], [0], [0], [1], [0, 0, 1, 1], [], []>} : vector<2x32xf32>, vector<32x128xf32>, vector<2x128xf32> -> vector<2x128xf32>
    %185 = arith.addf %183, %184 : vector<2x128xf32>
    %186 = arith.index_cast %c2_i32_58 : i32 to index
    %c0_71 = arith.constant 0 : index
    %c0_72 = arith.constant 0 : index
    %187 = vector.load %arg9[%186, %c0_71, %c0_72] : memref<8x2x128xf32, #tpu.memory_space<vmem>>, vector<1x2x128xf32>
    %188 = vector.shape_cast %187 : vector<1x2x128xf32> to vector<2x128xf32>
    %189 = vector.shape_cast %185 : vector<2x128xf32> to vector<1x2x128xf32>
    tpu.vector_store %arg9[%186, %c0_71, %c0_72], %189 {strides = array<i32>} : memref<8x2x128xf32, #tpu.memory_space<vmem>>, vector<1x2x128xf32>,
    %190 = arith.index_cast %138 : i32 to index
    %c0_73 = arith.constant 0 : index
    %c0_74 = arith.constant 0 : index
    %191 = vector.load %arg9[%190, %c0_73, %c0_74] : memref<8x2x128xf32, #tpu.memory_space<vmem>>, vector<1x2x128xf32>
    %192 = vector.shape_cast %191 : vector<1x2x128xf32> to vector<2x128xf32>
    %cst_75 = arith.constant dense<0.000000e+00> : vector<2x128xf32>
    %193 = tpu.matmul %180, %14, %cst_75 {dimension_numbers = #tpu.dot_dimension_numbers<[1], [0], [0], [1], [0, 0, 1, 1], [], []>} : vector<2x32xf32>, vector<32x128xf32>, vector<2x128xf32> -> vector<2x128xf32>
    %194 = arith.addf %192, %193 : vector<2x128xf32>
    %195 = arith.index_cast %138 : i32 to index
    %c0_76 = arith.constant 0 : index
    %c0_77 = arith.constant 0 : index
    %196 = vector.load %arg9[%195, %c0_76, %c0_77] : memref<8x2x128xf32, #tpu.memory_space<vmem>>, vector<1x2x128xf32>
    %197 = vector.shape_cast %196 : vector<1x2x128xf32> to vector<2x128xf32>
    %198 = vector.shape_cast %194 : vector<2x128xf32> to vector<1x2x128xf32>
    tpu.vector_store %arg9[%195, %c0_76, %c0_77], %198 {strides = array<i32>} : memref<8x2x128xf32, #tpu.memory_space<vmem>>, vector<1x2x128xf32>,
    %c3_i32 = arith.constant 3 : i32
    %c7_i32_78 = arith.constant 7 : i32
    %199 = arith.subi %c7_i32_78, %c3_i32 : i32
    %c2_i32_79 = arith.constant 2 : i32
    %200 = arith.muli %c3_i32, %c2_i32_79 : i32
    %201 = arith.index_cast %200 : i32 to index
    %c0_80 = arith.constant 0 : index
    %202 = vector.load %arg10[%201, %c0_80] : memref<16x256xf32, #tpu.memory_space<vmem>>, vector<2x256xf32>
    %203 = vector.extract_strided_slice %202 {offsets = [0, 0], sizes = [2, 128], strides = [1, 1]} : vector<2x256xf32> to vector<2x128xf32>
    %c2_i32_81 = arith.constant 2 : i32
    %204 = arith.muli %199, %c2_i32_81 : i32
    %205 = arith.index_cast %204 : i32 to index
    %c0_82 = arith.constant 0 : index
    %206 = vector.load %arg10[%205, %c0_82] : memref<16x256xf32, #tpu.memory_space<vmem>>, vector<2x256xf32>
    %207 = vector.extract_strided_slice %206 {offsets = [0, 128], sizes = [2, 128], strides = [1, 1]} : vector<2x256xf32> to vector<2x128xf32>
    %cst_83 = arith.constant dense<0.000000e+00> : vector<2x128xf32>
    %208 = tpu.matmul %165, %11, %cst_83 {dimension_numbers = #tpu.dot_dimension_numbers<[1], [0], [0], [1], [0, 0, 1, 1], [], []>} : vector<2x32xf32>, vector<32x128xf32>, vector<2x128xf32> -> vector<2x128xf32>
    %209 = arith.addf %203, %208 : vector<2x128xf32>
    %cst_84 = arith.constant dense<0.000000e+00> : vector<2x128xf32>
    %210 = tpu.matmul %180, %12, %cst_84 {dimension_numbers = #tpu.dot_dimension_numbers<[1], [0], [0], [1], [0, 0, 1, 1], [], []>} : vector<2x32xf32>, vector<32x128xf32>, vector<2x128xf32> -> vector<2x128xf32>
    %211 = arith.addf %207, %210 : vector<2x128xf32>
    %212 = arith.negf %209 : vector<2x128xf32>
    %213 = math.exp %212 : vector<2x128xf32>
    %cst_85 = arith.constant 1.000000e+00 : f32
    %214 = vector.broadcast %cst_85 : f32 to vector<2x128xf32>
    %215 = arith.addf %214, %213 : vector<2x128xf32>
    %216 = arith.divf %214, %215 : vector<2x128xf32>
    %217 = math.tanh %209 : vector<2x128xf32>
    %218 = vector.extract_strided_slice %216 {offsets = [0, 0], sizes = [2, 32], strides = [1, 1]} : vector<2x128xf32> to vector<2x32xf32>
    %219 = vector.extract_strided_slice %216 {offsets = [0, 32], sizes = [2, 32], strides = [1, 1]} : vector<2x128xf32> to vector<2x32xf32>
    %220 = vector.extract_strided_slice %217 {offsets = [0, 64], sizes = [2, 32], strides = [1, 1]} : vector<2x128xf32> to vector<2x32xf32>
    %221 = vector.extract_strided_slice %216 {offsets = [0, 96], sizes = [2, 32], strides = [1, 1]} : vector<2x128xf32> to vector<2x32xf32>
    %222 = arith.mulf %219, %163 : vector<2x32xf32>
    %223 = arith.mulf %218, %220 : vector<2x32xf32>
    %224 = arith.addf %222, %223 : vector<2x32xf32>
    %225 = math.tanh %224 : vector<2x32xf32>
    %226 = arith.mulf %221, %225 : vector<2x32xf32>
    %227 = arith.negf %211 : vector<2x128xf32>
    %228 = math.exp %227 : vector<2x128xf32>
    %cst_86 = arith.constant 1.000000e+00 : f32
    %229 = vector.broadcast %cst_86 : f32 to vector<2x128xf32>
    %230 = arith.addf %229, %228 : vector<2x128xf32>
    %231 = arith.divf %229, %230 : vector<2x128xf32>
    %232 = math.tanh %211 : vector<2x128xf32>
    %233 = vector.extract_strided_slice %231 {offsets = [0, 0], sizes = [2, 32], strides = [1, 1]} : vector<2x128xf32> to vector<2x32xf32>
    %234 = vector.extract_strided_slice %231 {offsets = [0, 32], sizes = [2, 32], strides = [1, 1]} : vector<2x128xf32> to vector<2x32xf32>
    %235 = vector.extract_strided_slice %232 {offsets = [0, 64], sizes = [2, 32], strides = [1, 1]} : vector<2x128xf32> to vector<2x32xf32>
    %236 = vector.extract_strided_slice %231 {offsets = [0, 96], sizes = [2, 32], strides = [1, 1]} : vector<2x128xf32> to vector<2x32xf32>
    %237 = arith.mulf %234, %178 : vector<2x32xf32>
    %238 = arith.mulf %233, %235 : vector<2x32xf32>
    %239 = arith.addf %237, %238 : vector<2x32xf32>
    %240 = math.tanh %239 : vector<2x32xf32>
    %241 = arith.mulf %236, %240 : vector<2x32xf32>
    %242 = arith.index_cast %c3_i32 : i32 to index
    %c0_87 = arith.constant 0 : index
    %c0_88 = arith.constant 0 : index
    %243 = vector.load %arg9[%242, %c0_87, %c0_88] : memref<8x2x128xf32, #tpu.memory_space<vmem>>, vector<1x2x128xf32>
    %244 = vector.shape_cast %243 : vector<1x2x128xf32> to vector<2x128xf32>
    %cst_89 = arith.constant dense<0.000000e+00> : vector<2x128xf32>
    %245 = tpu.matmul %226, %13, %cst_89 {dimension_numbers = #tpu.dot_dimension_numbers<[1], [0], [0], [1], [0, 0, 1, 1], [], []>} : vector<2x32xf32>, vector<32x128xf32>, vector<2x128xf32> -> vector<2x128xf32>
    %246 = arith.addf %244, %245 : vector<2x128xf32>
    %247 = arith.index_cast %c3_i32 : i32 to index
    %c0_90 = arith.constant 0 : index
    %c0_91 = arith.constant 0 : index
    %248 = vector.load %arg9[%247, %c0_90, %c0_91] : memref<8x2x128xf32, #tpu.memory_space<vmem>>, vector<1x2x128xf32>
    %249 = vector.shape_cast %248 : vector<1x2x128xf32> to vector<2x128xf32>
    %250 = vector.shape_cast %246 : vector<2x128xf32> to vector<1x2x128xf32>
    tpu.vector_store %arg9[%247, %c0_90, %c0_91], %250 {strides = array<i32>} : memref<8x2x128xf32, #tpu.memory_space<vmem>>, vector<1x2x128xf32>,
    %251 = arith.index_cast %199 : i32 to index
    %c0_92 = arith.constant 0 : index
    %c0_93 = arith.constant 0 : index
    %252 = vector.load %arg9[%251, %c0_92, %c0_93] : memref<8x2x128xf32, #tpu.memory_space<vmem>>, vector<1x2x128xf32>
    %253 = vector.shape_cast %252 : vector<1x2x128xf32> to vector<2x128xf32>
    %cst_94 = arith.constant dense<0.000000e+00> : vector<2x128xf32>
    %254 = tpu.matmul %241, %14, %cst_94 {dimension_numbers = #tpu.dot_dimension_numbers<[1], [0], [0], [1], [0, 0, 1, 1], [], []>} : vector<2x32xf32>, vector<32x128xf32>, vector<2x128xf32> -> vector<2x128xf32>
    %255 = arith.addf %253, %254 : vector<2x128xf32>
    %256 = arith.index_cast %199 : i32 to index
    %c0_95 = arith.constant 0 : index
    %c0_96 = arith.constant 0 : index
    %257 = vector.load %arg9[%256, %c0_95, %c0_96] : memref<8x2x128xf32, #tpu.memory_space<vmem>>, vector<1x2x128xf32>
    %258 = vector.shape_cast %257 : vector<1x2x128xf32> to vector<2x128xf32>
    %259 = vector.shape_cast %255 : vector<2x128xf32> to vector<1x2x128xf32>
    tpu.vector_store %arg9[%256, %c0_95, %c0_96], %259 {strides = array<i32>} : memref<8x2x128xf32, #tpu.memory_space<vmem>>, vector<1x2x128xf32>,
    %c4_i32 = arith.constant 4 : i32
    %c7_i32_97 = arith.constant 7 : i32
    %260 = arith.subi %c7_i32_97, %c4_i32 : i32
    %c2_i32_98 = arith.constant 2 : i32
    %261 = arith.muli %c4_i32, %c2_i32_98 : i32
    %262 = arith.index_cast %261 : i32 to index
    %c0_99 = arith.constant 0 : index
    %263 = vector.load %arg10[%262, %c0_99] : memref<16x256xf32, #tpu.memory_space<vmem>>, vector<2x256xf32>
    %264 = vector.extract_strided_slice %263 {offsets = [0, 0], sizes = [2, 128], strides = [1, 1]} : vector<2x256xf32> to vector<2x128xf32>
    %c2_i32_100 = arith.constant 2 : i32
    %265 = arith.muli %260, %c2_i32_100 : i32
    %266 = arith.index_cast %265 : i32 to index
    %c0_101 = arith.constant 0 : index
    %267 = vector.load %arg10[%266, %c0_101] : memref<16x256xf32, #tpu.memory_space<vmem>>, vector<2x256xf32>
    %268 = vector.extract_strided_slice %267 {offsets = [0, 128], sizes = [2, 128], strides = [1, 1]} : vector<2x256xf32> to vector<2x128xf32>
    %cst_102 = arith.constant dense<0.000000e+00> : vector<2x128xf32>
    %269 = tpu.matmul %226, %11, %cst_102 {dimension_numbers = #tpu.dot_dimension_numbers<[1], [0], [0], [1], [0, 0, 1, 1], [], []>} : vector<2x32xf32>, vector<32x128xf32>, vector<2x128xf32> -> vector<2x128xf32>
    %270 = arith.addf %264, %269 : vector<2x128xf32>
    %cst_103 = arith.constant dense<0.000000e+00> : vector<2x128xf32>
    %271 = tpu.matmul %241, %12, %cst_103 {dimension_numbers = #tpu.dot_dimension_numbers<[1], [0], [0], [1], [0, 0, 1, 1], [], []>} : vector<2x32xf32>, vector<32x128xf32>, vector<2x128xf32> -> vector<2x128xf32>
    %272 = arith.addf %268, %271 : vector<2x128xf32>
    %273 = arith.negf %270 : vector<2x128xf32>
    %274 = math.exp %273 : vector<2x128xf32>
    %cst_104 = arith.constant 1.000000e+00 : f32
    %275 = vector.broadcast %cst_104 : f32 to vector<2x128xf32>
    %276 = arith.addf %275, %274 : vector<2x128xf32>
    %277 = arith.divf %275, %276 : vector<2x128xf32>
    %278 = math.tanh %270 : vector<2x128xf32>
    %279 = vector.extract_strided_slice %277 {offsets = [0, 0], sizes = [2, 32], strides = [1, 1]} : vector<2x128xf32> to vector<2x32xf32>
    %280 = vector.extract_strided_slice %277 {offsets = [0, 32], sizes = [2, 32], strides = [1, 1]} : vector<2x128xf32> to vector<2x32xf32>
    %281 = vector.extract_strided_slice %278 {offsets = [0, 64], sizes = [2, 32], strides = [1, 1]} : vector<2x128xf32> to vector<2x32xf32>
    %282 = vector.extract_strided_slice %277 {offsets = [0, 96], sizes = [2, 32], strides = [1, 1]} : vector<2x128xf32> to vector<2x32xf32>
    %283 = arith.mulf %280, %224 : vector<2x32xf32>
    %284 = arith.mulf %279, %281 : vector<2x32xf32>
    %285 = arith.addf %283, %284 : vector<2x32xf32>
    %286 = math.tanh %285 : vector<2x32xf32>
    %287 = arith.mulf %282, %286 : vector<2x32xf32>
    %288 = arith.negf %272 : vector<2x128xf32>
    %289 = math.exp %288 : vector<2x128xf32>
    %cst_105 = arith.constant 1.000000e+00 : f32
    %290 = vector.broadcast %cst_105 : f32 to vector<2x128xf32>
    %291 = arith.addf %290, %289 : vector<2x128xf32>
    %292 = arith.divf %290, %291 : vector<2x128xf32>
    %293 = math.tanh %272 : vector<2x128xf32>
    %294 = vector.extract_strided_slice %292 {offsets = [0, 0], sizes = [2, 32], strides = [1, 1]} : vector<2x128xf32> to vector<2x32xf32>
    %295 = vector.extract_strided_slice %292 {offsets = [0, 32], sizes = [2, 32], strides = [1, 1]} : vector<2x128xf32> to vector<2x32xf32>
    %296 = vector.extract_strided_slice %293 {offsets = [0, 64], sizes = [2, 32], strides = [1, 1]} : vector<2x128xf32> to vector<2x32xf32>
    %297 = vector.extract_strided_slice %292 {offsets = [0, 96], sizes = [2, 32], strides = [1, 1]} : vector<2x128xf32> to vector<2x32xf32>
    %298 = arith.mulf %295, %239 : vector<2x32xf32>
    %299 = arith.mulf %294, %296 : vector<2x32xf32>
    %300 = arith.addf %298, %299 : vector<2x32xf32>
    %301 = math.tanh %300 : vector<2x32xf32>
    %302 = arith.mulf %297, %301 : vector<2x32xf32>
    %303 = arith.index_cast %c4_i32 : i32 to index
    %c0_106 = arith.constant 0 : index
    %c0_107 = arith.constant 0 : index
    %304 = vector.load %arg9[%303, %c0_106, %c0_107] : memref<8x2x128xf32, #tpu.memory_space<vmem>>, vector<1x2x128xf32>
    %305 = vector.shape_cast %304 : vector<1x2x128xf32> to vector<2x128xf32>
    %cst_108 = arith.constant dense<0.000000e+00> : vector<2x128xf32>
    %306 = tpu.matmul %287, %13, %cst_108 {dimension_numbers = #tpu.dot_dimension_numbers<[1], [0], [0], [1], [0, 0, 1, 1], [], []>} : vector<2x32xf32>, vector<32x128xf32>, vector<2x128xf32> -> vector<2x128xf32>
    %307 = arith.addf %305, %306 : vector<2x128xf32>
    %308 = arith.index_cast %c4_i32 : i32 to index
    %c0_109 = arith.constant 0 : index
    %c0_110 = arith.constant 0 : index
    %309 = vector.load %arg9[%308, %c0_109, %c0_110] : memref<8x2x128xf32, #tpu.memory_space<vmem>>, vector<1x2x128xf32>
    %310 = vector.shape_cast %309 : vector<1x2x128xf32> to vector<2x128xf32>
    %311 = vector.shape_cast %307 : vector<2x128xf32> to vector<1x2x128xf32>
    tpu.vector_store %arg9[%308, %c0_109, %c0_110], %311 {strides = array<i32>} : memref<8x2x128xf32, #tpu.memory_space<vmem>>, vector<1x2x128xf32>,
    %312 = arith.index_cast %260 : i32 to index
    %c0_111 = arith.constant 0 : index
    %c0_112 = arith.constant 0 : index
    %313 = vector.load %arg9[%312, %c0_111, %c0_112] : memref<8x2x128xf32, #tpu.memory_space<vmem>>, vector<1x2x128xf32>
    %314 = vector.shape_cast %313 : vector<1x2x128xf32> to vector<2x128xf32>
    %cst_113 = arith.constant dense<0.000000e+00> : vector<2x128xf32>
    %315 = tpu.matmul %302, %14, %cst_113 {dimension_numbers = #tpu.dot_dimension_numbers<[1], [0], [0], [1], [0, 0, 1, 1], [], []>} : vector<2x32xf32>, vector<32x128xf32>, vector<2x128xf32> -> vector<2x128xf32>
    %316 = arith.addf %314, %315 : vector<2x128xf32>
    %317 = arith.index_cast %260 : i32 to index
    %c0_114 = arith.constant 0 : index
    %c0_115 = arith.constant 0 : index
    %318 = vector.load %arg9[%317, %c0_114, %c0_115] : memref<8x2x128xf32, #tpu.memory_space<vmem>>, vector<1x2x128xf32>
    %319 = vector.shape_cast %318 : vector<1x2x128xf32> to vector<2x128xf32>
    %320 = vector.shape_cast %316 : vector<2x128xf32> to vector<1x2x128xf32>
    tpu.vector_store %arg9[%317, %c0_114, %c0_115], %320 {strides = array<i32>} : memref<8x2x128xf32, #tpu.memory_space<vmem>>, vector<1x2x128xf32>,
    %c5_i32 = arith.constant 5 : i32
    %c7_i32_116 = arith.constant 7 : i32
    %321 = arith.subi %c7_i32_116, %c5_i32 : i32
    %c2_i32_117 = arith.constant 2 : i32
    %322 = arith.muli %c5_i32, %c2_i32_117 : i32
    %323 = arith.index_cast %322 : i32 to index
    %c0_118 = arith.constant 0 : index
    %324 = vector.load %arg10[%323, %c0_118] : memref<16x256xf32, #tpu.memory_space<vmem>>, vector<2x256xf32>
    %325 = vector.extract_strided_slice %324 {offsets = [0, 0], sizes = [2, 128], strides = [1, 1]} : vector<2x256xf32> to vector<2x128xf32>
    %c2_i32_119 = arith.constant 2 : i32
    %326 = arith.muli %321, %c2_i32_119 : i32
    %327 = arith.index_cast %326 : i32 to index
    %c0_120 = arith.constant 0 : index
    %328 = vector.load %arg10[%327, %c0_120] : memref<16x256xf32, #tpu.memory_space<vmem>>, vector<2x256xf32>
    %329 = vector.extract_strided_slice %328 {offsets = [0, 128], sizes = [2, 128], strides = [1, 1]} : vector<2x256xf32> to vector<2x128xf32>
    %cst_121 = arith.constant dense<0.000000e+00> : vector<2x128xf32>
    %330 = tpu.matmul %287, %11, %cst_121 {dimension_numbers = #tpu.dot_dimension_numbers<[1], [0], [0], [1], [0, 0, 1, 1], [], []>} : vector<2x32xf32>, vector<32x128xf32>, vector<2x128xf32> -> vector<2x128xf32>
    %331 = arith.addf %325, %330 : vector<2x128xf32>
    %cst_122 = arith.constant dense<0.000000e+00> : vector<2x128xf32>
    %332 = tpu.matmul %302, %12, %cst_122 {dimension_numbers = #tpu.dot_dimension_numbers<[1], [0], [0], [1], [0, 0, 1, 1], [], []>} : vector<2x32xf32>, vector<32x128xf32>, vector<2x128xf32> -> vector<2x128xf32>
    %333 = arith.addf %329, %332 : vector<2x128xf32>
    %334 = arith.negf %331 : vector<2x128xf32>
    %335 = math.exp %334 : vector<2x128xf32>
    %cst_123 = arith.constant 1.000000e+00 : f32
    %336 = vector.broadcast %cst_123 : f32 to vector<2x128xf32>
    %337 = arith.addf %336, %335 : vector<2x128xf32>
    %338 = arith.divf %336, %337 : vector<2x128xf32>
    %339 = math.tanh %331 : vector<2x128xf32>
    %340 = vector.extract_strided_slice %338 {offsets = [0, 0], sizes = [2, 32], strides = [1, 1]} : vector<2x128xf32> to vector<2x32xf32>
    %341 = vector.extract_strided_slice %338 {offsets = [0, 32], sizes = [2, 32], strides = [1, 1]} : vector<2x128xf32> to vector<2x32xf32>
    %342 = vector.extract_strided_slice %339 {offsets = [0, 64], sizes = [2, 32], strides = [1, 1]} : vector<2x128xf32> to vector<2x32xf32>
    %343 = vector.extract_strided_slice %338 {offsets = [0, 96], sizes = [2, 32], strides = [1, 1]} : vector<2x128xf32> to vector<2x32xf32>
    %344 = arith.mulf %341, %285 : vector<2x32xf32>
    %345 = arith.mulf %340, %342 : vector<2x32xf32>
    %346 = arith.addf %344, %345 : vector<2x32xf32>
    %347 = math.tanh %346 : vector<2x32xf32>
    %348 = arith.mulf %343, %347 : vector<2x32xf32>
    %349 = arith.negf %333 : vector<2x128xf32>
    %350 = math.exp %349 : vector<2x128xf32>
    %cst_124 = arith.constant 1.000000e+00 : f32
    %351 = vector.broadcast %cst_124 : f32 to vector<2x128xf32>
    %352 = arith.addf %351, %350 : vector<2x128xf32>
    %353 = arith.divf %351, %352 : vector<2x128xf32>
    %354 = math.tanh %333 : vector<2x128xf32>
    %355 = vector.extract_strided_slice %353 {offsets = [0, 0], sizes = [2, 32], strides = [1, 1]} : vector<2x128xf32> to vector<2x32xf32>
    %356 = vector.extract_strided_slice %353 {offsets = [0, 32], sizes = [2, 32], strides = [1, 1]} : vector<2x128xf32> to vector<2x32xf32>
    %357 = vector.extract_strided_slice %354 {offsets = [0, 64], sizes = [2, 32], strides = [1, 1]} : vector<2x128xf32> to vector<2x32xf32>
    %358 = vector.extract_strided_slice %353 {offsets = [0, 96], sizes = [2, 32], strides = [1, 1]} : vector<2x128xf32> to vector<2x32xf32>
    %359 = arith.mulf %356, %300 : vector<2x32xf32>
    %360 = arith.mulf %355, %357 : vector<2x32xf32>
    %361 = arith.addf %359, %360 : vector<2x32xf32>
    %362 = math.tanh %361 : vector<2x32xf32>
    %363 = arith.mulf %358, %362 : vector<2x32xf32>
    %364 = arith.index_cast %c5_i32 : i32 to index
    %c0_125 = arith.constant 0 : index
    %c0_126 = arith.constant 0 : index
    %365 = vector.load %arg9[%364, %c0_125, %c0_126] : memref<8x2x128xf32, #tpu.memory_space<vmem>>, vector<1x2x128xf32>
    %366 = vector.shape_cast %365 : vector<1x2x128xf32> to vector<2x128xf32>
    %cst_127 = arith.constant dense<0.000000e+00> : vector<2x128xf32>
    %367 = tpu.matmul %348, %13, %cst_127 {dimension_numbers = #tpu.dot_dimension_numbers<[1], [0], [0], [1], [0, 0, 1, 1], [], []>} : vector<2x32xf32>, vector<32x128xf32>, vector<2x128xf32> -> vector<2x128xf32>
    %368 = arith.addf %366, %367 : vector<2x128xf32>
    %369 = arith.index_cast %c5_i32 : i32 to index
    %c0_128 = arith.constant 0 : index
    %c0_129 = arith.constant 0 : index
    %370 = vector.load %arg9[%369, %c0_128, %c0_129] : memref<8x2x128xf32, #tpu.memory_space<vmem>>, vector<1x2x128xf32>
    %371 = vector.shape_cast %370 : vector<1x2x128xf32> to vector<2x128xf32>
    %372 = vector.shape_cast %368 : vector<2x128xf32> to vector<1x2x128xf32>
    tpu.vector_store %arg9[%369, %c0_128, %c0_129], %372 {strides = array<i32>} : memref<8x2x128xf32, #tpu.memory_space<vmem>>, vector<1x2x128xf32>,
    %373 = arith.index_cast %321 : i32 to index
    %c0_130 = arith.constant 0 : index
    %c0_131 = arith.constant 0 : index
    %374 = vector.load %arg9[%373, %c0_130, %c0_131] : memref<8x2x128xf32, #tpu.memory_space<vmem>>, vector<1x2x128xf32>
    %375 = vector.shape_cast %374 : vector<1x2x128xf32> to vector<2x128xf32>
    %cst_132 = arith.constant dense<0.000000e+00> : vector<2x128xf32>
    %376 = tpu.matmul %363, %14, %cst_132 {dimension_numbers = #tpu.dot_dimension_numbers<[1], [0], [0], [1], [0, 0, 1, 1], [], []>} : vector<2x32xf32>, vector<32x128xf32>, vector<2x128xf32> -> vector<2x128xf32>
    %377 = arith.addf %375, %376 : vector<2x128xf32>
    %378 = arith.index_cast %321 : i32 to index
    %c0_133 = arith.constant 0 : index
    %c0_134 = arith.constant 0 : index
    %379 = vector.load %arg9[%378, %c0_133, %c0_134] : memref<8x2x128xf32, #tpu.memory_space<vmem>>, vector<1x2x128xf32>
    %380 = vector.shape_cast %379 : vector<1x2x128xf32> to vector<2x128xf32>
    %381 = vector.shape_cast %377 : vector<2x128xf32> to vector<1x2x128xf32>
    tpu.vector_store %arg9[%378, %c0_133, %c0_134], %381 {strides = array<i32>} : memref<8x2x128xf32, #tpu.memory_space<vmem>>, vector<1x2x128xf32>,
    %c6_i32 = arith.constant 6 : i32
    %c7_i32_135 = arith.constant 7 : i32
    %382 = arith.subi %c7_i32_135, %c6_i32 : i32
    %c2_i32_136 = arith.constant 2 : i32
    %383 = arith.muli %c6_i32, %c2_i32_136 : i32
    %384 = arith.index_cast %383 : i32 to index
    %c0_137 = arith.constant 0 : index
    %385 = vector.load %arg10[%384, %c0_137] : memref<16x256xf32, #tpu.memory_space<vmem>>, vector<2x256xf32>
    %386 = vector.extract_strided_slice %385 {offsets = [0, 0], sizes = [2, 128], strides = [1, 1]} : vector<2x256xf32> to vector<2x128xf32>
    %c2_i32_138 = arith.constant 2 : i32
    %387 = arith.muli %382, %c2_i32_138 : i32
    %388 = arith.index_cast %387 : i32 to index
    %c0_139 = arith.constant 0 : index
    %389 = vector.load %arg10[%388, %c0_139] : memref<16x256xf32, #tpu.memory_space<vmem>>, vector<2x256xf32>
    %390 = vector.extract_strided_slice %389 {offsets = [0, 128], sizes = [2, 128], strides = [1, 1]} : vector<2x256xf32> to vector<2x128xf32>
    %cst_140 = arith.constant dense<0.000000e+00> : vector<2x128xf32>
    %391 = tpu.matmul %348, %11, %cst_140 {dimension_numbers = #tpu.dot_dimension_numbers<[1], [0], [0], [1], [0, 0, 1, 1], [], []>} : vector<2x32xf32>, vector<32x128xf32>, vector<2x128xf32> -> vector<2x128xf32>
    %392 = arith.addf %386, %391 : vector<2x128xf32>
    %cst_141 = arith.constant dense<0.000000e+00> : vector<2x128xf32>
    %393 = tpu.matmul %363, %12, %cst_141 {dimension_numbers = #tpu.dot_dimension_numbers<[1], [0], [0], [1], [0, 0, 1, 1], [], []>} : vector<2x32xf32>, vector<32x128xf32>, vector<2x128xf32> -> vector<2x128xf32>
    %394 = arith.addf %390, %393 : vector<2x128xf32>
    %395 = arith.negf %392 : vector<2x128xf32>
    %396 = math.exp %395 : vector<2x128xf32>
    %cst_142 = arith.constant 1.000000e+00 : f32
    %397 = vector.broadcast %cst_142 : f32 to vector<2x128xf32>
    %398 = arith.addf %397, %396 : vector<2x128xf32>
    %399 = arith.divf %397, %398 : vector<2x128xf32>
    %400 = math.tanh %392 : vector<2x128xf32>
    %401 = vector.extract_strided_slice %399 {offsets = [0, 0], sizes = [2, 32], strides = [1, 1]} : vector<2x128xf32> to vector<2x32xf32>
    %402 = vector.extract_strided_slice %399 {offsets = [0, 32], sizes = [2, 32], strides = [1, 1]} : vector<2x128xf32> to vector<2x32xf32>
    %403 = vector.extract_strided_slice %400 {offsets = [0, 64], sizes = [2, 32], strides = [1, 1]} : vector<2x128xf32> to vector<2x32xf32>
    %404 = vector.extract_strided_slice %399 {offsets = [0, 96], sizes = [2, 32], strides = [1, 1]} : vector<2x128xf32> to vector<2x32xf32>
    %405 = arith.mulf %402, %346 : vector<2x32xf32>
    %406 = arith.mulf %401, %403 : vector<2x32xf32>
    %407 = arith.addf %405, %406 : vector<2x32xf32>
    %408 = math.tanh %407 : vector<2x32xf32>
    %409 = arith.mulf %404, %408 : vector<2x32xf32>
    %410 = arith.negf %394 : vector<2x128xf32>
    %411 = math.exp %410 : vector<2x128xf32>
    %cst_143 = arith.constant 1.000000e+00 : f32
    %412 = vector.broadcast %cst_143 : f32 to vector<2x128xf32>
    %413 = arith.addf %412, %411 : vector<2x128xf32>
    %414 = arith.divf %412, %413 : vector<2x128xf32>
    %415 = math.tanh %394 : vector<2x128xf32>
    %416 = vector.extract_strided_slice %414 {offsets = [0, 0], sizes = [2, 32], strides = [1, 1]} : vector<2x128xf32> to vector<2x32xf32>
    %417 = vector.extract_strided_slice %414 {offsets = [0, 32], sizes = [2, 32], strides = [1, 1]} : vector<2x128xf32> to vector<2x32xf32>
    %418 = vector.extract_strided_slice %415 {offsets = [0, 64], sizes = [2, 32], strides = [1, 1]} : vector<2x128xf32> to vector<2x32xf32>
    %419 = vector.extract_strided_slice %414 {offsets = [0, 96], sizes = [2, 32], strides = [1, 1]} : vector<2x128xf32> to vector<2x32xf32>
    %420 = arith.mulf %417, %361 : vector<2x32xf32>
    %421 = arith.mulf %416, %418 : vector<2x32xf32>
    %422 = arith.addf %420, %421 : vector<2x32xf32>
    %423 = math.tanh %422 : vector<2x32xf32>
    %424 = arith.mulf %419, %423 : vector<2x32xf32>
    %425 = arith.index_cast %c6_i32 : i32 to index
    %c0_144 = arith.constant 0 : index
    %c0_145 = arith.constant 0 : index
    %426 = vector.load %arg9[%425, %c0_144, %c0_145] : memref<8x2x128xf32, #tpu.memory_space<vmem>>, vector<1x2x128xf32>
    %427 = vector.shape_cast %426 : vector<1x2x128xf32> to vector<2x128xf32>
    %cst_146 = arith.constant dense<0.000000e+00> : vector<2x128xf32>
    %428 = tpu.matmul %409, %13, %cst_146 {dimension_numbers = #tpu.dot_dimension_numbers<[1], [0], [0], [1], [0, 0, 1, 1], [], []>} : vector<2x32xf32>, vector<32x128xf32>, vector<2x128xf32> -> vector<2x128xf32>
    %429 = arith.addf %427, %428 : vector<2x128xf32>
    %430 = arith.index_cast %c6_i32 : i32 to index
    %c0_147 = arith.constant 0 : index
    %c0_148 = arith.constant 0 : index
    %431 = vector.load %arg9[%430, %c0_147, %c0_148] : memref<8x2x128xf32, #tpu.memory_space<vmem>>, vector<1x2x128xf32>
    %432 = vector.shape_cast %431 : vector<1x2x128xf32> to vector<2x128xf32>
    %433 = vector.shape_cast %429 : vector<2x128xf32> to vector<1x2x128xf32>
    tpu.vector_store %arg9[%430, %c0_147, %c0_148], %433 {strides = array<i32>} : memref<8x2x128xf32, #tpu.memory_space<vmem>>, vector<1x2x128xf32>,
    %434 = arith.index_cast %382 : i32 to index
    %c0_149 = arith.constant 0 : index
    %c0_150 = arith.constant 0 : index
    %435 = vector.load %arg9[%434, %c0_149, %c0_150] : memref<8x2x128xf32, #tpu.memory_space<vmem>>, vector<1x2x128xf32>
    %436 = vector.shape_cast %435 : vector<1x2x128xf32> to vector<2x128xf32>
    %cst_151 = arith.constant dense<0.000000e+00> : vector<2x128xf32>
    %437 = tpu.matmul %424, %14, %cst_151 {dimension_numbers = #tpu.dot_dimension_numbers<[1], [0], [0], [1], [0, 0, 1, 1], [], []>} : vector<2x32xf32>, vector<32x128xf32>, vector<2x128xf32> -> vector<2x128xf32>
    %438 = arith.addf %436, %437 : vector<2x128xf32>
    %439 = arith.index_cast %382 : i32 to index
    %c0_152 = arith.constant 0 : index
    %c0_153 = arith.constant 0 : index
    %440 = vector.load %arg9[%439, %c0_152, %c0_153] : memref<8x2x128xf32, #tpu.memory_space<vmem>>, vector<1x2x128xf32>
    %441 = vector.shape_cast %440 : vector<1x2x128xf32> to vector<2x128xf32>
    %442 = vector.shape_cast %438 : vector<2x128xf32> to vector<1x2x128xf32>
    tpu.vector_store %arg9[%439, %c0_152, %c0_153], %442 {strides = array<i32>} : memref<8x2x128xf32, #tpu.memory_space<vmem>>, vector<1x2x128xf32>,
    %c7_i32_154 = arith.constant 7 : i32
    %c7_i32_155 = arith.constant 7 : i32
    %443 = arith.subi %c7_i32_155, %c7_i32_154 : i32
    %c2_i32_156 = arith.constant 2 : i32
    %444 = arith.muli %c7_i32_154, %c2_i32_156 : i32
    %445 = arith.index_cast %444 : i32 to index
    %c0_157 = arith.constant 0 : index
    %446 = vector.load %arg10[%445, %c0_157] : memref<16x256xf32, #tpu.memory_space<vmem>>, vector<2x256xf32>
    %447 = vector.extract_strided_slice %446 {offsets = [0, 0], sizes = [2, 128], strides = [1, 1]} : vector<2x256xf32> to vector<2x128xf32>
    %c2_i32_158 = arith.constant 2 : i32
    %448 = arith.muli %443, %c2_i32_158 : i32
    %449 = arith.index_cast %448 : i32 to index
    %c0_159 = arith.constant 0 : index
    %450 = vector.load %arg10[%449, %c0_159] : memref<16x256xf32, #tpu.memory_space<vmem>>, vector<2x256xf32>
    %451 = vector.extract_strided_slice %450 {offsets = [0, 128], sizes = [2, 128], strides = [1, 1]} : vector<2x256xf32> to vector<2x128xf32>
    %cst_160 = arith.constant dense<0.000000e+00> : vector<2x128xf32>
    %452 = tpu.matmul %409, %11, %cst_160 {dimension_numbers = #tpu.dot_dimension_numbers<[1], [0], [0], [1], [0, 0, 1, 1], [], []>} : vector<2x32xf32>, vector<32x128xf32>, vector<2x128xf32> -> vector<2x128xf32>
    %453 = arith.addf %447, %452 : vector<2x128xf32>
    %cst_161 = arith.constant dense<0.000000e+00> : vector<2x128xf32>
    %454 = tpu.matmul %424, %12, %cst_161 {dimension_numbers = #tpu.dot_dimension_numbers<[1], [0], [0], [1], [0, 0, 1, 1], [], []>} : vector<2x32xf32>, vector<32x128xf32>, vector<2x128xf32> -> vector<2x128xf32>
    %455 = arith.addf %451, %454 : vector<2x128xf32>
    %456 = arith.negf %453 : vector<2x128xf32>
    %457 = math.exp %456 : vector<2x128xf32>
    %cst_162 = arith.constant 1.000000e+00 : f32
    %458 = vector.broadcast %cst_162 : f32 to vector<2x128xf32>
    %459 = arith.addf %458, %457 : vector<2x128xf32>
    %460 = arith.divf %458, %459 : vector<2x128xf32>
    %461 = math.tanh %453 : vector<2x128xf32>
    %462 = vector.extract_strided_slice %460 {offsets = [0, 0], sizes = [2, 32], strides = [1, 1]} : vector<2x128xf32> to vector<2x32xf32>
    %463 = vector.extract_strided_slice %460 {offsets = [0, 32], sizes = [2, 32], strides = [1, 1]} : vector<2x128xf32> to vector<2x32xf32>
    %464 = vector.extract_strided_slice %461 {offsets = [0, 64], sizes = [2, 32], strides = [1, 1]} : vector<2x128xf32> to vector<2x32xf32>
    %465 = vector.extract_strided_slice %460 {offsets = [0, 96], sizes = [2, 32], strides = [1, 1]} : vector<2x128xf32> to vector<2x32xf32>
    %466 = arith.mulf %463, %407 : vector<2x32xf32>
    %467 = arith.mulf %462, %464 : vector<2x32xf32>
    %468 = arith.addf %466, %467 : vector<2x32xf32>
    %469 = math.tanh %468 : vector<2x32xf32>
    %470 = arith.mulf %465, %469 : vector<2x32xf32>
    %471 = arith.negf %455 : vector<2x128xf32>
    %472 = math.exp %471 : vector<2x128xf32>
    %cst_163 = arith.constant 1.000000e+00 : f32
    %473 = vector.broadcast %cst_163 : f32 to vector<2x128xf32>
    %474 = arith.addf %473, %472 : vector<2x128xf32>
    %475 = arith.divf %473, %474 : vector<2x128xf32>
    %476 = math.tanh %455 : vector<2x128xf32>
    %477 = vector.extract_strided_slice %475 {offsets = [0, 0], sizes = [2, 32], strides = [1, 1]} : vector<2x128xf32> to vector<2x32xf32>
    %478 = vector.extract_strided_slice %475 {offsets = [0, 32], sizes = [2, 32], strides = [1, 1]} : vector<2x128xf32> to vector<2x32xf32>
    %479 = vector.extract_strided_slice %476 {offsets = [0, 64], sizes = [2, 32], strides = [1, 1]} : vector<2x128xf32> to vector<2x32xf32>
    %480 = vector.extract_strided_slice %475 {offsets = [0, 96], sizes = [2, 32], strides = [1, 1]} : vector<2x128xf32> to vector<2x32xf32>
    %481 = arith.mulf %478, %422 : vector<2x32xf32>
    %482 = arith.mulf %477, %479 : vector<2x32xf32>
    %483 = arith.addf %481, %482 : vector<2x32xf32>
    %484 = math.tanh %483 : vector<2x32xf32>
    %485 = arith.mulf %480, %484 : vector<2x32xf32>
    %486 = arith.index_cast %c7_i32_154 : i32 to index
    %c0_164 = arith.constant 0 : index
    %c0_165 = arith.constant 0 : index
    %487 = vector.load %arg9[%486, %c0_164, %c0_165] : memref<8x2x128xf32, #tpu.memory_space<vmem>>, vector<1x2x128xf32>
    %488 = vector.shape_cast %487 : vector<1x2x128xf32> to vector<2x128xf32>
    %cst_166 = arith.constant dense<0.000000e+00> : vector<2x128xf32>
    %489 = tpu.matmul %470, %13, %cst_166 {dimension_numbers = #tpu.dot_dimension_numbers<[1], [0], [0], [1], [0, 0, 1, 1], [], []>} : vector<2x32xf32>, vector<32x128xf32>, vector<2x128xf32> -> vector<2x128xf32>
    %490 = arith.addf %488, %489 : vector<2x128xf32>
    %491 = arith.index_cast %c7_i32_154 : i32 to index
    %c0_167 = arith.constant 0 : index
    %c0_168 = arith.constant 0 : index
    %492 = vector.load %arg9[%491, %c0_167, %c0_168] : memref<8x2x128xf32, #tpu.memory_space<vmem>>, vector<1x2x128xf32>
    %493 = vector.shape_cast %492 : vector<1x2x128xf32> to vector<2x128xf32>
    %494 = vector.shape_cast %490 : vector<2x128xf32> to vector<1x2x128xf32>
    tpu.vector_store %arg9[%491, %c0_167, %c0_168], %494 {strides = array<i32>} : memref<8x2x128xf32, #tpu.memory_space<vmem>>, vector<1x2x128xf32>,
    %495 = arith.index_cast %443 : i32 to index
    %c0_169 = arith.constant 0 : index
    %c0_170 = arith.constant 0 : index
    %496 = vector.load %arg9[%495, %c0_169, %c0_170] : memref<8x2x128xf32, #tpu.memory_space<vmem>>, vector<1x2x128xf32>
    %497 = vector.shape_cast %496 : vector<1x2x128xf32> to vector<2x128xf32>
    %cst_171 = arith.constant dense<0.000000e+00> : vector<2x128xf32>
    %498 = tpu.matmul %485, %14, %cst_171 {dimension_numbers = #tpu.dot_dimension_numbers<[1], [0], [0], [1], [0, 0, 1, 1], [], []>} : vector<2x32xf32>, vector<32x128xf32>, vector<2x128xf32> -> vector<2x128xf32>
    %499 = arith.addf %497, %498 : vector<2x128xf32>
    %500 = arith.index_cast %443 : i32 to index
    %c0_172 = arith.constant 0 : index
    %c0_173 = arith.constant 0 : index
    %501 = vector.load %arg9[%500, %c0_172, %c0_173] : memref<8x2x128xf32, #tpu.memory_space<vmem>>, vector<1x2x128xf32>
    %502 = vector.shape_cast %501 : vector<1x2x128xf32> to vector<2x128xf32>
    %503 = vector.shape_cast %499 : vector<2x128xf32> to vector<1x2x128xf32>
    tpu.vector_store %arg9[%500, %c0_172, %c0_173], %503 {strides = array<i32>} : memref<8x2x128xf32, #tpu.memory_space<vmem>>, vector<1x2x128xf32>,
    %c8_i32 = arith.constant 8 : i32
    return
  }
  func.func @transform_0(%arg0: i32) -> (i32, i32) {
    %c0_i32 = arith.constant 0 : i32
    %c0_i32_0 = arith.constant 0 : i32
    %c0_i32_1 = arith.constant 0 : i32
    return %c0_i32, %c0_i32_0 : i32, i32
  }
  func.func @transform_1(%arg0: i32) -> (i32, i32) {
    %c0_i32 = arith.constant 0 : i32
    %c0_i32_0 = arith.constant 0 : i32
    %c0_i32_1 = arith.constant 0 : i32
    return %c0_i32, %c0_i32_0 : i32, i32
  }
  func.func @transform_2(%arg0: i32) -> (i32, i32) {
    %c0_i32 = arith.constant 0 : i32
    %c0_i32_0 = arith.constant 0 : i32
    %c0_i32_1 = arith.constant 0 : i32
    return %c0_i32, %c0_i32_0 : i32, i32
  }
  func.func @transform_3(%arg0: i32) -> (i32, i32) {
    %c0_i32 = arith.constant 0 : i32
    %c0_i32_0 = arith.constant 0 : i32
    %c0_i32_1 = arith.constant 0 : i32
    return %c0_i32, %c0_i32_0 : i32, i32
  }
  func.func @transform_4(%arg0: i32) -> (i32, i32) {
    %c0_i32 = arith.constant 0 : i32
    %c0_i32_0 = arith.constant 0 : i32
    %c0_i32_1 = arith.constant 0 : i32
    return %c0_i32, %c0_i32_0 : i32, i32
  }
  func.func @transform_5(%arg0: i32) -> (i32, i32) {
    %c0_i32 = arith.constant 0 : i32
    %c0_i32_0 = arith.constant 0 : i32
    %c0_i32_1 = arith.constant 0 : i32
    return %c0_i32, %c0_i32_0 : i32, i32
  }
  func.func @transform_6(%arg0: i32) -> (i32, i32) {
    %c0_i32 = arith.constant 0 : i32
    %c0_i32_0 = arith.constant 0 : i32
    %c0_i32_1 = arith.constant 0 : i32
    return %c0_i32, %c0_i32_0 : i32, i32
  }
  func.func @transform_7(%arg0: i32) -> (i32, i32, i32) {
    %c0_i32 = arith.constant 0 : i32
    %c0_i32_0 = arith.constant 0 : i32
    %c0_i32_1 = arith.constant 0 : i32
    %c0_i32_2 = arith.constant 0 : i32
    return %c0_i32, %c0_i32_0, %c0_i32_1 : i32, i32, i32
  }
  func.func @transform_8(%arg0: i32) -> (i32, i32, i32) {
    %c0_i32 = arith.constant 0 : i32
    %c0_i32_0 = arith.constant 0 : i32
    %c0_i32_1 = arith.constant 0 : i32
    %c0_i32_2 = arith.constant 0 : i32
    return %c0_i32, %c0_i32_0, %c0_i32_1 : i32, i32, i32
  }
}

</mosaic_0001>

<bundles_post_ra>
// kernel: tpu_custom_call.1
= control target key start
LH: loop header
LB: loop body
LE: loop exit
PB: predicated region body
PF: predicated region fallthrough
CT: control target
= control target key end

     0   :  { %13 = vsyncpa [#allocation4], 0  ;;  %s4760_s0 = inlined_call_operand.hbm [shape: f32[16,32], index: 0, kind: input, shape index: {}]   ;;  %s4761_s1 = inlined_call_operand.hbm [shape: f32[32,256], index: 1, kind: input, shape index: {}]   ;;  %s4762_s2 = inlined_call_operand.vmem [shape: f32[1,256], index: 2, kind: input, shape index: {}]   ;;  %s4763_s3 = inlined_call_operand.hbm [shape: f32[32,128], index: 3, kind: input, shape index: {}]   ;;  %s4764_s4 = inlined_call_operand.hbm [shape: f32[32,128], index: 4, kind: input, shape index: {}]   ;;  %s4765_s5 = inlined_call_operand.hbm [shape: f32[32,128], index: 5, kind: input, shape index: {}]   ;;  %s4766_s6 = inlined_call_operand.hbm [shape: f32[32,128], index: 6, kind: input, shape index: {}]   ;;  %s4767_s7 = inlined_call_operand.vmem [shape: f32[1,1,128], index: 7, kind: input, shape index: {}]   ;;  %s4768_s8 = inlined_call_operand.hbm [shape: f32[8,2,128], index: 8, kind: output, shape index: {}]  }
   0x1   :  { %14 = vsyncpa [#allocation7], 0 }
   0x2   :  { %15 = vsyncpa [#allocation10], 0 }
   0x3   :  { %16 = vsyncpa [#allocation13], 0 }
   0x4   :  { %17 = vsyncpa [#allocation5], 0  ;;  %s4227_s27 = smov [#allocation6]   ;;  %s4063_s9 = scalar_lea.hbm %s4761_s1, 1024 }
   0x5   :  { %s35_s28 = sshll.u32 %s4227_s27, 4  ;;  %p4064_p0 = scmp.ne.s32.totalorder %s4761_s1, %s4063_s9  ;;  %s36_s28 = int_to_ptr.vmem [resolvable:$true] %s35_s28 }
   0x6   :  { %p4067_p1 = scmp.lt.u32.totalorder %s4063_s9, %s4761_s1 }
   0x8   :  { %p4069_p2 = pnand %p4067_p1, %p4064_p0 }
   0xa   :  { %4072 = shalt.err (!%p4069_p2)
}
   0xb   :  { %s4073_s14 = scalar_lea.vmem %s36_s28, 1024  ;;  %p4078_p4 = scmp.lt.s32.totalorder %s36_s28, %s36_s28 }
   0xc   :  { %p4074_p3 = scmp.ne.s32.totalorder %s36_s28, %s4073_s14  ;;  %p4079_p5 = scmp.lt.s32.totalorder %s4073_s14, %s4073_s14 }
   0xe   :  { %p4080_p6 = por %p4079_p5, %p4078_p4 }
  0x10   :  { %p4081_p7 = pnand %p4080_p6, %p4074_p3 }
  0x12   :  { %4084 = shalt.err (!%p4081_p7)
}
  0x13   :  { %s4228_s15 = smov 256   ;;  %s4229_s16 = smov 16  }
  0x14   :  { %41 = dma.hbm_to_vmem [thread:$0]  %s4761_s1, 1024, %s36_s28, [#allocation7], %s4228_s15, %s4228_s15, %s4229_s16  }
  0x15   :  { %s4230_s19 = smov [#allocation9]   ;;  %s4231_s21 = smov [#allocation3]  }
  0x16   :  { %s61_s20 = sshll.u32 %s4230_s19, 4  ;;  %s23_s22 = sshll.u32 %s4231_s21, 4  ;;  %s62_s20 = int_to_ptr.vmem [resolvable:$true] %s61_s20  ;;  %s24_s22 = int_to_ptr.vmem [resolvable:$true] %s23_s22 }
  0x17   :  { %s4085_s25 = scalar_lea.hbm %s4764_s4, 512 }
  0x18   :  { %p4086_p8 = scmp.ne.s32.totalorder %s4764_s4, %s4085_s25  ;;  %p4089_p9 = scmp.lt.u32.totalorder %s4085_s25, %s4764_s4 }
  0x1a   :  { %p4091_p10 = pnand %p4089_p9, %p4086_p8 }
  0x1c   :  { %4094 = shalt.err (!%p4091_p10)
}
  0x1d   :  { %s4095_s1 = scalar_lea.vmem %s62_s20, 512  ;;  %p4100_p12 = scmp.lt.s32.totalorder %s62_s20, %s62_s20 }
  0x1e   :  { %p4096_p11 = scmp.ne.s32.totalorder %s62_s20, %s4095_s1  ;;  %p4101_p13 = scmp.lt.s32.totalorder %s4095_s1, %s4095_s1 }
  0x20   :  { %p4102_p0 = por %p4101_p13, %p4100_p12 }
  0x22   :  { %p4103_p1 = pnand %p4102_p0, %p4096_p11 }
  0x24   :  { %4106 = shalt.err (!%p4103_p1)
}
  0x25   :  { %s4232_s28 = smov 128   ;;  %s4233_s9 = smov 8  }
  0x26   :  { %67 = dma.hbm_to_vmem [thread:$0]  %s4764_s4, 512, %s62_s20, [#allocation10], %s4232_s28, %s4232_s28, %s4233_s9  }
  0x27   :  { %s4107_s14 = scalar_lea.hbm %s4760_s0, 256 }
  0x28   :  { %p4108_p2 = scmp.ne.s32.totalorder %s4760_s0, %s4107_s14  ;;  %p4111_p3 = scmp.lt.u32.totalorder %s4107_s14, %s4760_s0 }
  0x2a   :  { %p4113_p4 = pnand %p4111_p3, %p4108_p2 }
  0x2c   :  { %4116 = shalt.err (!%p4113_p4)
}
  0x2d   :  { %s4117_s19 = scalar_lea.vmem %s24_s22, 256  ;;  %p4122_p6 = scmp.lt.s32.totalorder %s24_s22, %s24_s22 }
  0x2e   :  { %p4118_p5 = scmp.ne.s32.totalorder %s24_s22, %s4117_s19  ;;  %p4123_p7 = scmp.lt.s32.totalorder %s4117_s19, %s4117_s19 }
  0x30   :  { %p4124_p8 = por %p4123_p7, %p4122_p6 }
  0x32   :  { %p4125_p9 = pnand %p4124_p8, %p4118_p5 }
  0x34   :  { %4128 = shalt.err (!%p4125_p9)
}
  0x35   :  { %29 = dma.hbm_to_vmem [thread:$0]  %s4760_s0, 256, %s24_s22, [#allocation4], %s4232_s28, %s4232_s28, %s4233_s9  }
  0x36   :  { %s4234_s21 = smov [#allocation8]   ;;  %s4235_s24 = smov [#allocation11]  }
  0x37   :  { %s49_s23 = sshll.u32 %s4234_s21, 4  ;;  %s73_s25 = sshll.u32 %s4235_s24, 4  ;;  %s50_s23 = int_to_ptr.vmem [resolvable:$true] %s49_s23  ;;  %s74_s25 = int_to_ptr.vmem [resolvable:$true] %s73_s25 }
  0x38   :  { %s4129_s29 = scalar_lea.hbm %s4763_s3, 512 }
  0x39   :  { %p4130_p10 = scmp.ne.s32.totalorder %s4763_s3, %s4129_s29  ;;  %p4133_p11 = scmp.lt.u32.totalorder %s4129_s29, %s4763_s3 }
  0x3b   :  { %p4135_p12 = pnand %p4133_p11, %p4130_p10 }
  0x3d   :  { %4138 = shalt.err (!%p4135_p12)
}
  0x3e   :  { %s4139_s0 = scalar_lea.vmem %s50_s23, 512  ;;  %p4144_p0 = scmp.lt.s32.totalorder %s50_s23, %s50_s23 }
  0x3f   :  { %p4140_p13 = scmp.ne.s32.totalorder %s50_s23, %s4139_s0  ;;  %p4145_p1 = scmp.lt.s32.totalorder %s4139_s0, %s4139_s0 }
  0x41   :  { %p4146_p2 = por %p4145_p1, %p4144_p0 }
  0x43   :  { %p4147_p3 = pnand %p4146_p2, %p4140_p13 }
  0x45   :  { %4150 = shalt.err (!%p4147_p3)
}
  0x46   :  { %55 = dma.hbm_to_vmem [thread:$0]  %s4763_s3, 512, %s50_s23, [#allocation7], %s4232_s28, %s4232_s28, %s4233_s9  }
  0x47   :  { %s4151_s15 = scalar_lea.hbm %s4765_s5, 512 }
  0x48   :  { %p4152_p4 = scmp.ne.s32.totalorder %s4765_s5, %s4151_s15  ;;  %p4155_p5 = scmp.lt.u32.totalorder %s4151_s15, %s4765_s5 }
  0x4a   :  { %p4157_p6 = pnand %p4155_p5, %p4152_p4 }
  0x4c   :  { %4160 = shalt.err (!%p4157_p6)
}
  0x4d   :  { %s4161_s4 = scalar_lea.vmem %s74_s25, 512  ;;  %p4166_p8 = scmp.lt.s32.totalorder %s74_s25, %s74_s25 }
  0x4e   :  { %p4162_p7 = scmp.ne.s32.totalorder %s74_s25, %s4161_s4  ;;  %p4167_p9 = scmp.lt.s32.totalorder %s4161_s4, %s4161_s4 }
  0x50   :  { %p4168_p10 = por %p4167_p9, %p4166_p8 }
  0x52   :  { %p4169_p11 = pnand %p4168_p10, %p4162_p7 }
  0x54   :  { %4172 = shalt.err (!%p4169_p11)
}
  0x55   :  { %79 = dma.hbm_to_vmem [thread:$0]  %s4765_s5, 512, %s74_s25, [#allocation10], %s4232_s28, %s4232_s28, %s4233_s9  }
  0x56   :  { %s4236_s21 = smov [#allocation12]   ;;  %s4173_s27 = scalar_lea.hbm %s4766_s6, 512 }
  0x57   :  { %s85_s23 = sshll.u32 %s4236_s21, 4  ;;  %p4174_p12 = scmp.ne.s32.totalorder %s4766_s6, %s4173_s27  ;;  %s86_s23 = int_to_ptr.vmem [resolvable:$true] %s85_s23 }
  0x58   :  { %p4177_p13 = scmp.lt.u32.totalorder %s4173_s27, %s4766_s6 }
  0x5a   :  { %p4179_p0 = pnand %p4177_p13, %p4174_p12 }
  0x5c   :  { %4182 = shalt.err (!%p4179_p0)
}
  0x5d   :  { %s4183_s11 = scalar_lea.vmem %s86_s23, 512  ;;  %p4188_p2 = scmp.lt.s32.totalorder %s86_s23, %s86_s23 }
  0x5e   :  { %p4184_p1 = scmp.ne.s32.totalorder %s86_s23, %s4183_s11  ;;  %p4189_p3 = scmp.lt.s32.totalorder %s4183_s11, %s4183_s11 }
  0x60   :  { %p4190_p4 = por %p4189_p3, %p4188_p2 }
  0x62   :  { %p4191_p5 = pnand %p4190_p4, %p4184_p1 }
  0x64   :  { %4194 = shalt.err (!%p4191_p5)
}
  0x65   :  { %91 = dma.hbm_to_vmem [thread:$0]  %s4766_s6, 512, %s86_s23, [#allocation13], %s4232_s28, %s4232_s28, %s4233_s9  }
  0x66   :  { %4217 = dma.done.wait [#allocation4], 256  }
  0x67   :  { %4218 = vsyncadd [#allocation4], 4294967040 }
  0x68   :  { %4219 = dma.done.wait [#allocation7], 1536  }
  0x69   :  { %4220 = vsyncadd [#allocation7], 4294965760 }
  0x6a   :  { %4221 = dma.done.wait [#allocation10], 1024  }
  0x6b   :  { %4222 = vsyncadd [#allocation10], 4294966272 }
  0x6c   :  { %4223 = dma.done.wait [#allocation13], 512  }
  0x6d   :  { %4224 = vsyncadd [#allocation13], 4294966784  ;;  %v4237_v0 = vmov 0.0   ;;  %v4238_v1 = vmov 0.0|0.0   ;;  %vm4239_vm0 = vmmov 0   ;;  %v115_v2 = vld [vmem:[#allocation6 + $0x8] sm:$0xff]  ;;  %v124_v28 = vlaneseq }
  0x6e   :  { %205 = vmatprep.mubr.f32.mxu0 %v4237_v0  ;;  %3726 = vmatprep.subr.bf16.mxu1 %v4238_v1  ;;  %v117_v3 = vld [vmem:[#allocation6 + $0x18] sm:$0xff]  ;;  %v114_v4 = vld [vmem:[#allocation6] sm:$0xff]  ;;  %v116_v6 = vld [vmem:[#allocation6 + $0x10] sm:$0xff]  ;;  %vm134_vm1 = vcmask 261120   ;;  %s4241_s9 = smov 32  }
  0x6f   :  { %3374 = vmatprep.mubr.msk.f32.mxu1 %vm4239_vm0, %v4237_v0  ;;  %v3718_v5 = vpack.c.bf16 %v117_v3, %v115_v2  ;;  %v119_v7 = vld [vmem:[#allocation6 + $0x28] sm:$0xff]  ;;  %v121_v8 = vld [vmem:[#allocation6 + $0x38] sm:$0xff]  ;;  %v3720_v9 = vpack.c.bf16 %v116_v6, %v114_v4  ;;  %v118_v11 = vld [vmem:[#allocation6 + $0x20] sm:$0xff]  ;;  %v125_v29 = vshrl.u32 %v124_v28, 7 }
  0x70   :  { %v3722_v10 = vpack.c.bf16 %v121_v8, %v119_v7  ;;  %v120_v12 = vld [vmem:[#allocation6 + $0x30] sm:$0xff]  ;;  %v237_v13 = vld [vmem:[#allocation8] sm:$0xff]  ;;  %v238_v14 = vld [vmem:[#allocation8 + $0x8] sm:$0xff] }
  0x71   :  { %3719 = vmatprep.subr.bf16.mxu0 %v3718_v5  ;;  %v3724_v15 = vpack.c.bf16 %v120_v12, %v118_v11  ;;  %v4380_v16 = vpack.c.bf16 %v238_v14, %v237_v13  ;;  %v239_v17 = vld [vmem:[#allocation8 + $0x10] sm:$0xff]  ;;  %v241_v18 = vld [vmem:[#allocation9] sm:$0xff]  ;;  %v242_v19 = vld [vmem:[#allocation9 + $0x8] sm:$0xff]  ;;  %v126_v30 = vsub.s32 0, %v125_v29  ;;  %v130_v32 = vsub.s32 1, %v125_v29 }
  0x72   :  { %3721 = vmatpush1.bf16.msra.mxu0 %v3720_v9  ;;  %v240_v20 = vld [vmem:[#allocation8 + $0x18] sm:$0xff]  ;;  %v112_v22 = vld [vmem:[#allocation3] sm:$0xff]  ;;  %v4386_v23 = vpack.c.bf16 %v242_v19, %v241_v18  ;;  %v246_v11 = vld [vmem:[#allocation11 + $0x8] sm:$0xff] }
  0x73   :  { %3723 = vmatprep.subr.bf16.mxu0 %v3722_v10  ;;  %3728 = vmatpush3.bf16.msra.mxu1 %v4380_v16  ;;  %v4383_v21 = vpack.c.bf16 %v240_v20, %v239_v17  ;;  %v243_v24 = vld [vmem:[#allocation9 + $0x10] sm:$0xff]  ;;  %v244_v25 = vld [vmem:[#allocation9 + $0x18] sm:$0xff]  ;;  %v245_v10 = vld [vmem:[#allocation11] sm:$0xff] }
  0x74   :  { %3729 = vmatprep.subr.bf16.mxu1 %v4238_v1  ;;  %v113_v26 = vld [vmem:[#allocation3 + $0x8] sm:$0xff]  ;;  %v4394_v27 = vpack.c.bf16 %v244_v25, %v243_v24  ;;  %v122_v31 = vld [vmem:[%s4762_s2] sm:$0x3]  ;;  %s4240_s2 = smov 64   ;;  %v4421_v13 = vpack.c.bf16 %v246_v11, %v245_v10  ;;  %v250_v17 = vld [vmem:[#allocation12 + $0x8] sm:$0xff] }
  0x75   :  { %v127_v33 = vrot.slane %v122_v31, %v126_v30  ;;  %v131_v34 = vrot.slane %v122_v31, %v130_v32  ;;  %v247_v12 = vld [vmem:[#allocation11 + $0x10] sm:$0xff]  ;;  %v248_v14 = vld [vmem:[#allocation11 + $0x18] sm:$0xff] }
  0x76   :  { %3725 = vmatpush1.bf16.msra.mxu0 %v3724_v15  ;;  %v249_v15 = vld [vmem:[#allocation12] sm:$0xff]  ;;  %v4426_v20 = vpack.c.bf16 %v248_v14, %v247_v12  ;;  %v251_v24 = vld [vmem:[#allocation12 + $0x10] sm:$0xff]  ;;  %v252_v25 = vld [vmem:[#allocation12 + $0x18] sm:$0xff] }
  0x77   :  { %3732 = vmatprep.subr.bf16.mxu0 %v4238_v1  ;;  %3731 = vmatpush3.bf16.msra.mxu1 %v4383_v21  ;;  %v4423_v18 = vpack.c.bf16 %v250_v17, %v249_v15  ;;  %v3159_v31 = vld [vmem:[%s4767_s7] ss:$0 sm:$0xff]  ;;  %s4242_s7 = smov [#allocation14]  }
  0x78   :  { %3738 = vmatprep.subr.bf16.mxu1 %v4238_v1  ;;  %229 = vst [vmem:[#allocation14] sm:$0x3] %v3159_v31  ;;  %230 = vst [vmem:[#allocation14 + $0x2] sm:$0x3] %v3159_v31  ;;  %s3142_s12 = sshll.u32 %s4242_s7, 4  ;;  %s3143_s12 = int_to_ptr.vmem [resolvable:$true] %s3142_s12 }
  0x79   :  { %3157 = vmatmul.mubr.msk.f32.vlgmr.msra.gmra.mrb[0].mxu0 %vm134_vm1, %v112_v22  ;;  %231 = vst [vmem:[#allocation14 + $0x4] sm:$0x3] %v3159_v31  ;;  %232 = vst [vmem:[#allocation14 + $0x6] sm:$0x3] %v3159_v31  ;;  %s4195_s13 = scalar_lea.vmem %s3143_s12, 256  ;;  %p4200_p7 = scmp.lt.s32.totalorder %s3143_s12, %s3143_s12 }
  0x7a   :  { %211 = vmatprep.mubr.f32.mxu0 %v4237_v0  ;;  %3734 = vmatpush3.bf16.msra.mxu0 %v4386_v23  ;;  %233 = vst [vmem:[#allocation14 + $0x8] sm:$0x3] %v3159_v31  ;;  %234 = vst [vmem:[#allocation14 + $0xa] sm:$0x3] %v3159_v31  ;;  %p4196_p6 = scmp.ne.s32.totalorder %s3143_s12, %s4195_s13  ;;  %p4201_p8 = scmp.lt.s32.totalorder %s4195_s13, %s4195_s13 }
  0x7b   :  { %3735 = vmatprep.subr.bf16.mxu0 %v4238_v1  ;;  %3375 = vmatmul.mubr.f32.vlgmr.msra.gmra.mrb[0].mxu1 %v4237_v0  ;;  %235 = vst [vmem:[#allocation14 + $0xc] sm:$0x3] %v3159_v31  ;;  %236 = vst [vmem:[#allocation14 + $0xe] sm:$0x3] %v3159_v31 }
  0x7c   :  { %3396 = vmatprep.mubr.msk.f32.mxu1 %vm4239_vm0, %v4237_v0  ;;  %3740 = vmatpush3.bf16.msra.mxu1 %v4421_v13  ;;  %p4202_p9 = por %p4201_p8, %p4200_p7 }
  0x7d   :  { %3158 = vmatmul.mubr.msk.f32.gmra.mrb[2].mxu0 %vm134_vm1, %v113_v26  ;;  %3741 = vmatprep.subr.bf16.mxu1 %v4238_v1  ;;  %v4435_v26 = vpack.c.bf16 %v252_v25, %v251_v24 }
  0x7e   :  { %3737 = vmatpush3.bf16.msra.mxu0 %v4394_v27  ;;  %3385 = vmatprep.mubr.msk.f32.mxu0 %vm4239_vm0, %v4237_v0  ;;  %p4203_p10 = pnand %p4202_p9, %p4196_p6 }
  0x7f   :  { %3744 = vmatprep.subr.bf16.mxu0 %v4238_v1 }
  0x80   :  { %3743 = vmatpush3.bf16.msra.mxu1 %v4426_v20 }
  0x81   :  { %3386 = vmatmul.mubr.f32.vlgmr.msra.gmra.mrb[4].mxu0 %v4237_v0  ;;  %3750 = vmatprep.subr.bf16.mxu1 %v4238_v1 }
  0x82   :  { %3407 = vmatprep.mubr.msk.f32.mxu0 %vm4239_vm0, %v4237_v0  ;;  %3746 = vmatpush3.bf16.msra.mxu0 %v4423_v18 }
  0x83   :  { %3747 = vmatprep.subr.bf16.mxu0 %v4238_v1 }
  0x86   :  { %3749 = vmatpush3.bf16.msra.mxu0 %v4435_v26 }
  0x87   :  { %3756 = vmatprep.subr.bf16.mxu0 %v4238_v1 }
 0x14c   :  { %v207_v35 = vpop.f32.mrb[0].mxu0 }
 0x14d   :  { %v208_v36 = vadd.f32 %v207_v35, %v127_v33  ;;  %v209_v37 = vpop.f32.mrb[1].mxu0 }
 0x14e   :  { %v210_v38 = vadd.f32 %v209_v37, %v131_v34  ;;  %v324_v39 = vpop.f32.mrb[0].mxu1 }
 0x14f   :  { %218 = vst [vmem:[#allocation2] sm:$0xff] %v208_v36  ;;  %v3376_v40 = vpop.f32.mrb[1].mxu1  ;;  %v451_v36 = vld [vmem:[#allocation14] sm:$0x3] }
 0x150   :  { %219 = vst [vmem:[#allocation2 + $0x8] sm:$0xff] %v210_v38  ;;  %v213_v41 = vpop.f32.mrb[2].mxu0  ;;  %v530_v40 = vld [vmem:[#allocation14 + $0xe] sm:$0x3] }
 0x151   :  { %v214_v42 = vadd.f32 %v213_v41, %v127_v33  ;;  %v215_v43 = vpop.f32.mrb[3].mxu0 }
 0x152   :  { %v216_v44 = vadd.f32 %v215_v43, %v131_v34 }
 0x153   :  { %220 = vst [vmem:[#allocation2 + $0x10] sm:$0xff] %v214_v42 }
 0x154   :  { %221 = vst [vmem:[#allocation2 + $0x18] sm:$0xff] %v216_v44  ;;  %v395_v45 = vpop.f32.mrb[4].mxu0 }
 0x155   :  { %v3387_v46 = vpop.f32.mrb[5].mxu0  ;;  %v400_v49 = vrot.slane %v395_v45, 2 }
 0x156   :  { %v253_v47 = vld [vmem:[#allocation2] sm:$0x3] }
 0x157   :  { %v328_v48 = vadd.f32 %v324_v39, %v253_v47  ;;  %v609_v47 = vld [vmem:[#allocation2] sm:$0xc] }
 0x159   :  { %3935 = vtanh.f32 %v328_v48  ;;  %v3160_v54 = vmul.f32 -1.442695, %v328_v48 }
 0x15b   :  { %v254_v50 = vld [vmem:[#allocation2 + $0x18] sm:$0xc0] }
 0x15c   :  { %v402_v51 = vadd.f32 %v400_v49, %v254_v50 }
 0x15e   :  { %3937 = vtanh.f32 %v402_v51  ;;  %v3161_v55 = vmul.f32 -1.442695, %v402_v51 }
 0x15f   :  { %3939 = vpow2.f32 %v3160_v54 }
 0x160   :  { %3941 = vpow2.f32 %v3161_v55 }
 0x163   :  { %v3936_v52 = vpop.eup %3935 }
 0x164   :  { %412 = vrot.lane.b32.xlu0 %v3936_v52, %s4240_s2  ;;  %v610_v52 = vld [vmem:[#allocation2 + $0x18] sm:$0x30] }
 0x168   :  { %v3938_v53 = vpop.eup %3937 }
 0x169   :  { %436 = vrot.lane.b32.xlu0 %v3938_v53, %s4240_s2  ;;  %v3940_v56 = vpop.eup %3939 }
 0x16a   :  { %v406_v57 = vadd.f32 1.0, %v3940_v56  ;;  %v3942_v58 = vpop.eup %3941 }
 0x16b   :  { %v430_v59 = vadd.f32 1.0, %v3942_v58 }
 0x16c   :  { %3943 = vrcp.f32 %v406_v57 }
 0x16d   :  { %3945 = vrcp.f32 %v430_v59 }
 0x176   :  { %v3944_v60 = vpop.eup %3943 }
 0x177   :  { %v3946_v63 = vpop.eup %3945  ;;  %v410_v4 = vmul.f32 0.0, %v3944_v60 }
 0x178   :  { %v434_v7 = vmul.f32 0.0, %v3946_v63 }
 0x1d6   :  { %v413_v61 = vpop.permute.xlu0 %412 }
 0x1d7   :  { %v415_v62 = vmul.f32 %v3944_v60, %v413_v61 }
 0x1d9   :  { %417 = vrot.lane.b32.xlu1 %v415_v62, %s4241_s9 }
 0x1db   :  { %v437_v2 = vpop.permute.xlu0 %436 }
 0x1dc   :  { %v439_v3 = vmul.f32 %v3946_v63, %v437_v2 }
 0x1de   :  { %441 = vrot.lane.b32.xlu1 %v439_v3, %s4241_s9 }
 0x24b   :  { %v418_v5 = vpop.permute.xlu1 %417 }
 0x24c   :  { %v4415_v6 = vadd.f32 %v418_v5, %v410_v4 }
 0x24e   :  { %3947 = vtanh.f32 %v4415_v6 }
 0x250   :  { %v442_v8 = vpop.permute.xlu1 %441 }
 0x251   :  { %v4418_v9 = vadd.f32 %v442_v8, %v434_v7  ;;  %v767_v7 = vrot.slane %v4415_v6, 6 }
 0x253   :  { %3949 = vtanh.f32 %v4418_v9  ;;  %v794_v12 = vrot.slane %v4418_v9, 2 }
 0x258   :  { %v3948_v19 = vpop.eup %3947 }
 0x259   :  { %423 = vrot.lane.b32.xlu0 %v3948_v19, %s4240_s2 }
 0x25d   :  { %v3950_v22 = vpop.eup %3949 }
 0x25e   :  { %447 = vrot.lane.b32.xlu1 %v3950_v22, %s4240_s2 }
 0x2cb   :  { %v424_v28 = vpop.permute.xlu0 %423 }
 0x2cc   :  { %v426_v29 = vmul.f32 %v3944_v60, %v424_v28 }
 0x2ce   :  { %453 = vrot.lane.b32.xlu0 %v426_v29, %s4241_s9 }
 0x2d0   :  { %v448_v30 = vpop.permute.xlu1 %447 }
 0x2d1   :  { %v450_v32 = vmul.f32 %v3946_v63, %v448_v30 }
 0x2d3   :  { %v532_v33 = vrot.slane %v450_v32, 6  ;;  %v814_v32 = vld [vmem:[#allocation14 + $0x2] sm:$0x3] }
 0x2d5   :  { %533 = vrot.lane.b32.xlu1 %v532_v33, %s4241_s9 }
 0x340   :  { %v454_v34 = vpop.permute.xlu0 %453 }
 0x341   :  { %3397 = vmatmul.mubr.msk.f32.vlgmr.msra.gmra.mrb[2].mxu1 %vm134_vm1, %v454_v34 }
 0x342   :  { %3752 = vmatpush3.bf16.msra.mxu1 %v4380_v16  ;;  %3418 = vmatprep.mubr.msk.f32.mxu1 %vm4239_vm0, %v4237_v0 }
 0x343   :  { %3753 = vmatprep.subr.bf16.mxu1 %v4238_v1 }
 0x346   :  { %3755 = vmatpush3.bf16.msra.mxu1 %v4383_v21 }
 0x347   :  { %v534_v35 = vpop.permute.xlu1 %533  ;;  %3762 = vmatprep.subr.bf16.mxu1 %v4238_v1 }
 0x348   :  { %3408 = vmatmul.mubr.msk.f32.vlgmr.msra.gmra.mrb[6].mxu0 %vm134_vm1, %v534_v35 }
 0x349   :  { %3419 = vmatmul.mubr.msk.f32.vlgmr.msra.gmra.mrb[4].mxu1 %vm134_vm1, %v454_v34  ;;  %3758 = vmatpush3.bf16.msra.mxu0 %v4386_v23 }
 0x34a   :  { %3759 = vmatprep.subr.bf16.mxu0 %v4238_v1  ;;  %3429 = vmatprep.mubr.msk.f32.mxu0 %vm4239_vm0, %v4237_v0 }
 0x34b   :  { %3764 = vmatpush3.bf16.msra.mxu1 %v4421_v13  ;;  %3440 = vmatprep.mubr.msk.f32.mxu1 %vm4239_vm0, %v4237_v0 }
 0x34c   :  { %3765 = vmatprep.subr.bf16.mxu1 %v4238_v1 }
 0x34d   :  { %3761 = vmatpush3.bf16.msra.mxu0 %v4394_v27 }
 0x34e   :  { %3768 = vmatprep.subr.bf16.mxu0 %v4238_v1 }
 0x34f   :  { %3767 = vmatpush3.bf16.msra.mxu1 %v4426_v20 }
 0x350   :  { %3430 = vmatmul.mubr.msk.f32.vlgmr.msra.gmra.mrb[8].mxu0 %vm134_vm1, %v534_v35  ;;  %3774 = vmatprep.subr.bf16.mxu1 %v4238_v1 }
 0x351   :  { %3770 = vmatpush3.bf16.msra.mxu0 %v4423_v18  ;;  %3451 = vmatprep.mubr.msk.f32.mxu0 %vm4239_vm0, %v4237_v0 }
 0x352   :  { %3771 = vmatprep.subr.bf16.mxu0 %v4238_v1 }
 0x355   :  { %3773 = vmatpush3.bf16.msra.mxu0 %v4435_v26 }
 0x356   :  { %3780 = vmatprep.subr.bf16.mxu0 %v4238_v1 }
 0x414   :  { %v523_v37 = vpop.f32.mrb[2].mxu1 }
 0x415   :  { %v527_v38 = vadd.f32 %v523_v37, %v451_v36  ;;  %v3398_v39 = vpop.f32.mrb[3].mxu1  ;;  %v894_v36 = vld [vmem:[#allocation14 + $0xc] sm:$0x3] }
 0x417   :  { %528 = vst [vmem:[#allocation14] sm:$0x3] %v527_v38 }
 0x41b   :  { %v603_v41 = vpop.f32.mrb[6].mxu0 }
 0x41c   :  { %v607_v42 = vadd.f32 %v603_v41, %v530_v40  ;;  %v677_v43 = vpop.f32.mrb[4].mxu1  ;;  %v3409_v44 = vpop.f32.mrb[7].mxu0 }
 0x41d   :  { %v682_v45 = vrot.slane %v677_v43, 6  ;;  %v3420_v46 = vpop.f32.mrb[5].mxu1  ;;  %v973_v43 = vld [vmem:[#allocation2] sm:$0x30] }
 0x41e   :  { %608 = vst [vmem:[#allocation14 + $0xe] sm:$0x3] %v607_v42 }
 0x41f   :  { %v684_v48 = vadd.f32 %v682_v45, %v609_v47 }
 0x421   :  { %3951 = vtanh.f32 %v684_v48  ;;  %v3166_v56 = vmul.f32 -1.442695, %v684_v48  ;;  %v974_v48 = vld [vmem:[#allocation2 + $0x18] sm:$0xc] }
 0x423   :  { %v751_v49 = vpop.f32.mrb[8].mxu0 }
 0x424   :  { %v756_v50 = vrot.slane %v751_v49, 4  ;;  %v3431_v51 = vpop.f32.mrb[9].mxu0 }
 0x426   :  { %v758_v53 = vadd.f32 %v756_v50, %v610_v52 }
 0x428   :  { %3953 = vtanh.f32 %v758_v53  ;;  %v3167_v57 = vmul.f32 -1.442695, %v758_v53 }
 0x429   :  { %3955 = vpow2.f32 %v3166_v56 }
 0x42a   :  { %3957 = vpow2.f32 %v3167_v57 }
 0x42b   :  { %v3952_v54 = vpop.eup %3951 }
 0x42c   :  { %771 = vrot.lane.b32.xlu0 %v3952_v54, %s4240_s2 }
 0x432   :  { %v3954_v55 = vpop.eup %3953 }
 0x433   :  { %798 = vrot.lane.b32.xlu1 %v3954_v55, %s4240_s2  ;;  %v3956_v58 = vpop.eup %3955 }
 0x434   :  { %v762_v59 = vadd.f32 1.0, %v3956_v58  ;;  %v3958_v60 = vpop.eup %3957 }
 0x435   :  { %v789_v61 = vadd.f32 1.0, %v3958_v60 }
 0x436   :  { %3959 = vrcp.f32 %v762_v59 }
 0x437   :  { %3961 = vrcp.f32 %v789_v61 }
 0x440   :  { %v3960_v62 = vpop.eup %3959 }
 0x441   :  { %v3962_v3 = vpop.eup %3961  ;;  %v769_v8 = vmul.f32 %v3960_v62, %v767_v7 }
 0x442   :  { %v796_v14 = vmul.f32 %v3962_v3, %v794_v12 }
 0x49e   :  { %v772_v63 = vpop.permute.xlu0 %771 }
 0x49f   :  { %v774_v2 = vmul.f32 %v3960_v62, %v772_v63 }
 0x4a1   :  { %776 = vrot.lane.b32.xlu0 %v774_v2, %s4241_s9 }
 0x4a5   :  { %v799_v4 = vpop.permute.xlu1 %798 }
 0x4a6   :  { %v801_v5 = vmul.f32 %v3962_v3, %v799_v4 }
 0x4a8   :  { %803 = vrot.lane.b32.xlu1 %v801_v5, %s4241_s9 }
 0x513   :  { %v777_v10 = vpop.permute.xlu0 %776 }
 0x514   :  { %v4477_v11 = vadd.f32 %v777_v10, %v769_v8 }
 0x516   :  { %3963 = vtanh.f32 %v4477_v11  ;;  %v1131_v2 = vrot.slane %v4477_v11, 6 }
 0x51a   :  { %v804_v15 = vpop.permute.xlu1 %803 }
 0x51b   :  { %v4481_v17 = vadd.f32 %v804_v15, %v796_v14 }
 0x51d   :  { %3965 = vtanh.f32 %v4481_v17  ;;  %v1158_v7 = vrot.slane %v4481_v17, 2 }
 0x520   :  { %v3964_v19 = vpop.eup %3963 }
 0x521   :  { %782 = vrot.lane.b32.xlu0 %v3964_v19, %s4240_s2 }
 0x527   :  { %v3966_v22 = vpop.eup %3965 }
 0x528   :  { %809 = vrot.lane.b32.xlu1 %v3966_v22, %s4240_s2 }
 0x593   :  { %v783_v6 = vpop.permute.xlu0 %782 }
 0x594   :  { %v785_v24 = vmul.f32 %v3960_v62, %v783_v6 }
 0x596   :  { %v816_v25 = vrot.slane %v785_v24, 2 }
 0x598   :  { %817 = vrot.lane.b32.xlu0 %v816_v25, %s4241_s9 }
 0x59a   :  { %v810_v28 = vpop.permute.xlu1 %809 }
 0x59b   :  { %v812_v29 = vmul.f32 %v3962_v3, %v810_v28 }
 0x59d   :  { %v896_v9 = vrot.slane %v812_v29, 4  ;;  %v1178_v29 = vld [vmem:[#allocation14 + $0x4] sm:$0x3] }
 0x59f   :  { %897 = vrot.lane.b32.xlu1 %v896_v9, %s4241_s9 }
 0x60a   :  { %v818_v30 = vpop.permute.xlu0 %817 }
 0x60b   :  { %3441 = vmatmul.mubr.msk.f32.vlgmr.msra.gmra.mrb[6].mxu1 %vm134_vm1, %v818_v30 }
 0x60c   :  { %3776 = vmatpush3.bf16.msra.mxu1 %v4380_v16  ;;  %3462 = vmatprep.mubr.msk.f32.mxu1 %vm4239_vm0, %v4237_v0 }
 0x60d   :  { %3777 = vmatprep.subr.bf16.mxu1 %v4238_v1 }
 0x610   :  { %3779 = vmatpush3.bf16.msra.mxu1 %v4383_v21 }
 0x611   :  { %v898_v31 = vpop.permute.xlu1 %897  ;;  %3786 = vmatprep.subr.bf16.mxu1 %v4238_v1 }
 0x612   :  { %3452 = vmatmul.mubr.msk.f32.vlgmr.msra.gmra.mrb[10].mxu0 %vm134_vm1, %v898_v31 }
 0x613   :  { %3463 = vmatmul.mubr.msk.f32.vlgmr.msra.gmra.mrb[8].mxu1 %vm134_vm1, %v818_v30  ;;  %3782 = vmatpush3.bf16.msra.mxu0 %v4386_v23 }
 0x614   :  { %3783 = vmatprep.subr.bf16.mxu0 %v4238_v1  ;;  %3473 = vmatprep.mubr.msk.f32.mxu0 %vm4239_vm0, %v4237_v0 }
 0x615   :  { %3788 = vmatpush3.bf16.msra.mxu1 %v4421_v13  ;;  %3484 = vmatprep.mubr.msk.f32.mxu1 %vm4239_vm0, %v4237_v0 }
 0x616   :  { %3789 = vmatprep.subr.bf16.mxu1 %v4238_v1 }
 0x617   :  { %3785 = vmatpush3.bf16.msra.mxu0 %v4394_v27 }
 0x618   :  { %3792 = vmatprep.subr.bf16.mxu0 %v4238_v1 }
 0x619   :  { %3791 = vmatpush3.bf16.msra.mxu1 %v4426_v20 }
 0x61a   :  { %3474 = vmatmul.mubr.msk.f32.vlgmr.msra.gmra.mrb[12].mxu0 %vm134_vm1, %v898_v31  ;;  %3798 = vmatprep.subr.bf16.mxu1 %v4238_v1 }
 0x61b   :  { %3794 = vmatpush3.bf16.msra.mxu0 %v4423_v18  ;;  %3495 = vmatprep.mubr.msk.f32.mxu0 %vm4239_vm0, %v4237_v0 }
 0x61c   :  { %3795 = vmatprep.subr.bf16.mxu0 %v4238_v1 }
 0x61f   :  { %3797 = vmatpush3.bf16.msra.mxu0 %v4435_v26 }
 0x620   :  { %3804 = vmatprep.subr.bf16.mxu0 %v4238_v1 }
 0x6de   :  { %v887_v33 = vpop.f32.mrb[6].mxu1 }
 0x6df   :  { %v891_v34 = vadd.f32 %v887_v33, %v814_v32  ;;  %v3442_v35 = vpop.f32.mrb[7].mxu1  ;;  %v1258_v32 = vld [vmem:[#allocation14 + $0xa] sm:$0x3] }
 0x6e1   :  { %892 = vst [vmem:[#allocation14 + $0x2] sm:$0x3] %v891_v34 }
 0x6e5   :  { %v967_v37 = vpop.f32.mrb[10].mxu0 }
 0x6e6   :  { %v971_v38 = vadd.f32 %v967_v37, %v894_v36  ;;  %v1041_v39 = vpop.f32.mrb[8].mxu1  ;;  %v3453_v40 = vpop.f32.mrb[11].mxu0 }
 0x6e7   :  { %v1046_v41 = vrot.slane %v1041_v39, 4  ;;  %v3464_v42 = vpop.f32.mrb[9].mxu1  ;;  %v1337_v39 = vld [vmem:[#allocation2] sm:$0xc0] }
 0x6e8   :  { %972 = vst [vmem:[#allocation14 + $0xc] sm:$0x3] %v971_v38 }
 0x6e9   :  { %v1048_v44 = vadd.f32 %v1046_v41, %v973_v43  ;;  %v1338_v41 = vld [vmem:[#allocation2 + $0x18] sm:$0x3] }
 0x6eb   :  { %3967 = vtanh.f32 %v1048_v44  ;;  %v3172_v52 = vmul.f32 -1.442695, %v1048_v44 }
 0x6ed   :  { %v1115_v45 = vpop.f32.mrb[12].mxu0 }
 0x6ee   :  { %v1120_v46 = vrot.slane %v1115_v45, 6  ;;  %v3475_v47 = vpop.f32.mrb[13].mxu0 }
 0x6f0   :  { %v1122_v49 = vadd.f32 %v1120_v46, %v974_v48 }
 0x6f2   :  { %3969 = vtanh.f32 %v1122_v49  ;;  %v3173_v53 = vmul.f32 -1.442695, %v1122_v49 }
 0x6f3   :  { %3971 = vpow2.f32 %v3172_v52 }
 0x6f4   :  { %3973 = vpow2.f32 %v3173_v53 }
 0x6f5   :  { %v3968_v50 = vpop.eup %3967 }
 0x6f6   :  { %1135 = vrot.lane.b32.xlu0 %v3968_v50, %s4240_s2 }
 0x6fc   :  { %v3970_v51 = vpop.eup %3969 }
 0x6fd   :  { %1162 = vrot.lane.b32.xlu1 %v3970_v51, %s4240_s2  ;;  %v3972_v54 = vpop.eup %3971 }
 0x6fe   :  { %v1126_v55 = vadd.f32 1.0, %v3972_v54  ;;  %v3974_v56 = vpop.eup %3973 }
 0x6ff   :  { %v1153_v57 = vadd.f32 1.0, %v3974_v56 }
 0x700   :  { %3975 = vrcp.f32 %v1126_v55 }
 0x701   :  { %3977 = vrcp.f32 %v1153_v57 }
 0x70a   :  { %v3976_v58 = vpop.eup %3975 }
 0x70b   :  { %v3978_v61 = vpop.eup %3977  ;;  %v1133_v3 = vmul.f32 %v3976_v58, %v1131_v2 }
 0x70c   :  { %v1160_v8 = vmul.f32 %v3978_v61, %v1158_v7 }
 0x768   :  { %v1136_v59 = vpop.permute.xlu0 %1135 }
 0x769   :  { %v1138_v60 = vmul.f32 %v3976_v58, %v1136_v59 }
 0x76b   :  { %1140 = vrot.lane.b32.xlu0 %v1138_v60, %s4241_s9 }
 0x76f   :  { %v1163_v62 = vpop.permute.xlu1 %1162 }
 0x770   :  { %v1165_v63 = vmul.f32 %v3978_v61, %v1163_v62 }
 0x772   :  { %1167 = vrot.lane.b32.xlu1 %v1165_v63, %s4241_s9 }
 0x7dd   :  { %v1141_v4 = vpop.permute.xlu0 %1140 }
 0x7de   :  { %v4521_v5 = vadd.f32 %v1141_v4, %v1133_v3 }
 0x7e0   :  { %3979 = vtanh.f32 %v4521_v5  ;;  %v1492_v59 = vrot.slane %v4521_v5, 6 }
 0x7e4   :  { %v1168_v10 = vpop.permute.xlu1 %1167 }
 0x7e5   :  { %v4525_v12 = vadd.f32 %v1168_v10, %v1160_v8 }
 0x7e7   :  { %3981 = vtanh.f32 %v4525_v12  ;;  %v1519_v63 = vrot.slane %v4525_v12, 2 }
 0x7ea   :  { %v3980_v14 = vpop.eup %3979 }
 0x7eb   :  { %1146 = vrot.lane.b32.xlu0 %v3980_v14, %s4240_s2 }
 0x7f1   :  { %v3982_v15 = vpop.eup %3981 }
 0x7f2   :  { %1173 = vrot.lane.b32.xlu1 %v3982_v15, %s4240_s2 }
 0x85d   :  { %v1147_v11 = vpop.permute.xlu0 %1146 }
 0x85e   :  { %v1149_v19 = vmul.f32 %v3976_v58, %v1147_v11 }
 0x860   :  { %v1180_v22 = vrot.slane %v1149_v19, 4 }
 0x862   :  { %1181 = vrot.lane.b32.xlu0 %v1180_v22, %s4241_s9  ;;  %v1539_v22 = vld [vmem:[#allocation14 + $0x6] sm:$0x3] }
 0x864   :  { %v1174_v6 = vpop.permute.xlu1 %1173 }
 0x865   :  { %v1176_v24 = vmul.f32 %v3978_v61, %v1174_v6 }
 0x867   :  { %v1260_v17 = vrot.slane %v1176_v24, 2 }
 0x869   :  { %1261 = vrot.lane.b32.xlu1 %v1260_v17, %s4241_s9 }
 0x8d4   :  { %v1182_v25 = vpop.permute.xlu0 %1181 }
 0x8d5   :  { %3485 = vmatmul.mubr.msk.f32.vlgmr.msra.gmra.mrb[10].mxu1 %vm134_vm1, %v1182_v25 }
 0x8d6   :  { %3800 = vmatpush3.bf16.msra.mxu1 %v4380_v16  ;;  %3506 = vmatprep.mubr.msk.f32.mxu1 %vm4239_vm0, %v4237_v0 }
 0x8d7   :  { %3801 = vmatprep.subr.bf16.mxu1 %v4238_v1 }
 0x8da   :  { %3803 = vmatpush3.bf16.msra.mxu1 %v4383_v21 }
 0x8db   :  { %v1262_v28 = vpop.permute.xlu1 %1261  ;;  %3810 = vmatprep.subr.bf16.mxu1 %v4238_v1 }
 0x8dc   :  { %3496 = vmatmul.mubr.msk.f32.vlgmr.msra.gmra.mrb[14].mxu0 %vm134_vm1, %v1262_v28 }
 0x8dd   :  { %3507 = vmatmul.mubr.msk.f32.vlgmr.msra.gmra.mrb[12].mxu1 %vm134_vm1, %v1182_v25  ;;  %3806 = vmatpush3.bf16.msra.mxu0 %v4386_v23  ;;  %v1619_v25 = vld [vmem:[#allocation14 + $0x8] sm:$0x3] }
 0x8de   :  { %3807 = vmatprep.subr.bf16.mxu0 %v4238_v1  ;;  %3517 = vmatprep.mubr.msk.f32.mxu0 %vm4239_vm0, %v4237_v0 }
 0x8df   :  { %3812 = vmatpush3.bf16.msra.mxu1 %v4421_v13  ;;  %3528 = vmatprep.mubr.msk.f32.mxu1 %vm4239_vm0, %v4237_v0 }
 0x8e0   :  { %3813 = vmatprep.subr.bf16.mxu1 %v4238_v1 }
 0x8e1   :  { %3809 = vmatpush3.bf16.msra.mxu0 %v4394_v27 }
 0x8e2   :  { %3816 = vmatprep.subr.bf16.mxu0 %v4238_v1 }
 0x8e3   :  { %3815 = vmatpush3.bf16.msra.mxu1 %v4426_v20 }
 0x8e4   :  { %3518 = vmatmul.mubr.msk.f32.vlgmr.msra.gmra.mrb[16].mxu0 %vm134_vm1, %v1262_v28  ;;  %3822 = vmatprep.subr.bf16.mxu1 %v4238_v1 }
 0x8e5   :  { %3818 = vmatpush3.bf16.msra.mxu0 %v4423_v18  ;;  %3539 = vmatprep.mubr.msk.f32.mxu0 %vm4239_vm0, %v4237_v0 }
 0x8e6   :  { %3819 = vmatprep.subr.bf16.mxu0 %v4238_v1 }
 0x8e9   :  { %3821 = vmatpush3.bf16.msra.mxu0 %v4435_v26 }
 0x8ea   :  { %3828 = vmatprep.subr.bf16.mxu0 %v4238_v1 }
 0x9a8   :  { %v1251_v9 = vpop.f32.mrb[10].mxu1 }
 0x9a9   :  { %v1255_v30 = vadd.f32 %v1251_v9, %v1178_v29  ;;  %v3486_v31 = vpop.f32.mrb[11].mxu1 }
 0x9ab   :  { %1256 = vst [vmem:[#allocation14 + $0x4] sm:$0x3] %v1255_v30  ;;  %v1697_v30 = vld [vmem:[#allocation2 + $0x10] sm:$0x3] }
 0x9af   :  { %v1331_v33 = vpop.f32.mrb[14].mxu0 }
 0x9b0   :  { %v1335_v34 = vadd.f32 %v1331_v33, %v1258_v32  ;;  %v1405_v35 = vpop.f32.mrb[12].mxu1  ;;  %v3497_v36 = vpop.f32.mrb[15].mxu0 }
 0x9b1   :  { %v1410_v37 = vrot.slane %v1405_v35, 2  ;;  %v3508_v38 = vpop.f32.mrb[13].mxu1 }
 0x9b2   :  { %1336 = vst [vmem:[#allocation14 + $0xa] sm:$0x3] %v1335_v34 }
 0x9b3   :  { %v1412_v40 = vadd.f32 %v1410_v37, %v1337_v39  ;;  %v1698_v37 = vld [vmem:[#allocation2 + $0x8] sm:$0xc0] }
 0x9b5   :  { %3983 = vtanh.f32 %v1412_v40  ;;  %v3178_v47 = vmul.f32 -1.442695, %v1412_v40 }
 0x9b7   :  { %v1479_v42 = vpop.f32.mrb[16].mxu0 }
 0x9b8   :  { %v1483_v43 = vadd.f32 %v1479_v42, %v1338_v41  ;;  %v3519_v44 = vpop.f32.mrb[17].mxu0 }
 0x9ba   :  { %3985 = vtanh.f32 %v1483_v43  ;;  %v3179_v48 = vmul.f32 -1.442695, %v1483_v43 }
 0x9bb   :  { %3987 = vpow2.f32 %v3178_v47 }
 0x9bc   :  { %3989 = vpow2.f32 %v3179_v48 }
 0x9bf   :  { %v3984_v45 = vpop.eup %3983 }
 0x9c0   :  { %1496 = vrot.lane.b32.xlu0 %v3984_v45, %s4240_s2 }
 0x9c4   :  { %v3986_v46 = vpop.eup %3985 }
 0x9c5   :  { %1523 = vrot.lane.b32.xlu1 %v3986_v46, %s4240_s2  ;;  %v3988_v49 = vpop.eup %3987 }
 0x9c6   :  { %v1487_v50 = vadd.f32 1.0, %v3988_v49  ;;  %v3990_v51 = vpop.eup %3989 }
 0x9c7   :  { %v1514_v52 = vadd.f32 1.0, %v3990_v51 }
 0x9c8   :  { %3991 = vrcp.f32 %v1487_v50 }
 0x9c9   :  { %3993 = vrcp.f32 %v1514_v52 }
 0x9d2   :  { %v3992_v53 = vpop.eup %3991 }
 0x9d3   :  { %v3994_v56 = vpop.eup %3993  ;;  %v1494_v60 = vmul.f32 %v3992_v53, %v1492_v59 }
 0x9d4   :  { %v1521_v2 = vmul.f32 %v3994_v56, %v1519_v63 }
 0xa32   :  { %v1497_v54 = vpop.permute.xlu0 %1496 }
 0xa33   :  { %v1499_v55 = vmul.f32 %v3992_v53, %v1497_v54 }
 0xa35   :  { %1501 = vrot.lane.b32.xlu0 %v1499_v55, %s4241_s9 }
 0xa37   :  { %v1524_v57 = vpop.permute.xlu1 %1523 }
 0xa38   :  { %v1526_v58 = vmul.f32 %v3994_v56, %v1524_v57 }
 0xa3a   :  { %1528 = vrot.lane.b32.xlu1 %v1526_v58, %s4241_s9 }
 0xaa7   :  { %v1502_v61 = vpop.permute.xlu0 %1501 }
 0xaa8   :  { %v4565_v62 = vadd.f32 %v1502_v61, %v1494_v60 }
 0xaaa   :  { %3995 = vtanh.f32 %v4565_v62 }
 0xaac   :  { %v1529_v3 = vpop.permute.xlu1 %1528 }
 0xaad   :  { %v4569_v4 = vadd.f32 %v1529_v3, %v1521_v2 }
 0xaaf   :  { %3997 = vtanh.f32 %v4569_v4  ;;  %v1879_v57 = vrot.slane %v4569_v4, 2 }
 0xab4   :  { %v3996_v7 = vpop.eup %3995 }
 0xab5   :  { %1507 = vrot.lane.b32.xlu0 %v3996_v7, %s4240_s2 }
 0xab9   :  { %v3998_v8 = vpop.eup %3997 }
 0xaba   :  { %1534 = vrot.lane.b32.xlu1 %v3998_v8, %s4240_s2 }
 0xb27   :  { %v1508_v5 = vpop.permute.xlu0 %1507 }
 0xb28   :  { %v1510_v10 = vmul.f32 %v3992_v53, %v1508_v5  ;;  %v1852_v53 = vrot.slane %v4565_v62, 6 }
 0xb2a   :  { %v1541_v14 = vrot.slane %v1510_v10, 6 }
 0xb2c   :  { %v1535_v15 = vpop.permute.xlu1 %1534  ;;  %1542 = vrot.lane.b32.xlu0 %v1541_v14, %s4241_s9 }
 0xb2d   :  { %v1537_v12 = vmul.f32 %v3994_v56, %v1535_v15 }
 0xb2f   :  { %1621 = vrot.lane.b32.xlu1 %v1537_v12, %s4241_s9 }
 0xb9e   :  { %v1543_v11 = vpop.permute.xlu0 %1542 }
 0xb9f   :  { %3529 = vmatmul.mubr.msk.f32.vlgmr.msra.gmra.mrb[14].mxu1 %vm134_vm1, %v1543_v11 }
 0xba0   :  { %3824 = vmatpush3.bf16.msra.mxu1 %v4380_v16  ;;  %3550 = vmatprep.mubr.msk.f32.mxu1 %vm4239_vm0, %v4237_v0 }
 0xba1   :  { %v1622_v19 = vpop.permute.xlu1 %1621  ;;  %3825 = vmatprep.subr.bf16.mxu1 %v4238_v1 }
 0xba2   :  { %3540 = vmatmul.mubr.msk.f32.vlgmr.msra.gmra.mrb[18].mxu0 %vm134_vm1, %v1622_v19 }
 0xba3   :  { %3830 = vmatpush3.bf16.msra.mxu0 %v4386_v23  ;;  %3561 = vmatprep.mubr.msk.f32.mxu0 %vm4239_vm0, %v4237_v0 }
 0xba4   :  { %3827 = vmatpush3.bf16.msra.mxu1 %v4383_v21  ;;  %3831 = vmatprep.subr.bf16.mxu0 %v4238_v1 }
 0xba5   :  { %3834 = vmatprep.subr.bf16.mxu1 %v4238_v1 }
 0xba7   :  { %3551 = vmatmul.mubr.msk.f32.vlgmr.msra.gmra.mrb[16].mxu1 %vm134_vm1, %v1543_v11  ;;  %3833 = vmatpush3.bf16.msra.mxu0 %v4394_v27 }
 0xba8   :  { %3836 = vmatpush3.bf16.msra.mxu1 %v4421_v13  ;;  %3840 = vmatprep.subr.bf16.mxu0 %v4238_v1 }
 0xba9   :  { %3837 = vmatprep.subr.bf16.mxu1 %v4238_v1  ;;  %3572 = vmatprep.mubr.msk.f32.mxu1 %vm4239_vm0, %v4237_v0 }
 0xbaa   :  { %3562 = vmatmul.mubr.msk.f32.vlgmr.msra.gmra.mrb[20].mxu0 %vm134_vm1, %v1622_v19 }
 0xbab   :  { %3842 = vmatpush3.bf16.msra.mxu0 %v4423_v18  ;;  %3583 = vmatprep.mubr.msk.f32.mxu0 %vm4239_vm0, %v4237_v0 }
 0xbac   :  { %3839 = vmatpush3.bf16.msra.mxu1 %v4426_v20  ;;  %3843 = vmatprep.subr.bf16.mxu0 %v4238_v1 }
 0xbad   :  { %3846 = vmatprep.subr.bf16.mxu1 %v4238_v1 }
 0xbaf   :  { %3845 = vmatpush3.bf16.msra.mxu0 %v4435_v26 }
 0xbb0   :  { %3852 = vmatprep.subr.bf16.mxu0 %v4238_v1 }
 0xc72   :  { %v1612_v6 = vpop.f32.mrb[14].mxu1 }
 0xc73   :  { %v1616_v24 = vadd.f32 %v1612_v6, %v1539_v22  ;;  %v3530_v17 = vpop.f32.mrb[15].mxu1 }
 0xc75   :  { %1617 = vst [vmem:[#allocation14 + $0x6] sm:$0x3] %v1616_v24  ;;  %v1691_v28 = vpop.f32.mrb[18].mxu0 }
 0xc76   :  { %v1695_v29 = vadd.f32 %v1691_v28, %v1619_v25  ;;  %v3541_v9 = vpop.f32.mrb[19].mxu0  ;;  %v2055_v28 = vld [vmem:[#allocation2 + $0x10] sm:$0xc] }
 0xc78   :  { %1696 = vst [vmem:[#allocation14 + $0x8] sm:$0x3] %v1695_v29 }
 0xc7a   :  { %v1765_v31 = vpop.f32.mrb[16].mxu1 }
 0xc7b   :  { %v1769_v32 = vadd.f32 %v1765_v31, %v1697_v30  ;;  %v3552_v33 = vpop.f32.mrb[17].mxu1 }
 0xc7c   :  { %v1976_v11 = vld [vmem:[#allocation14 + $0x6] sm:$0x3] }
 0xc7d   :  { %3999 = vtanh.f32 %v1769_v32  ;;  %v1836_v34 = vpop.f32.mrb[20].mxu0  ;;  %v3184_v41 = vmul.f32 -1.442695, %v1769_v32  ;;  %v2056_v32 = vld [vmem:[#allocation2 + $0x8] sm:$0x30] }
 0xc7e   :  { %v1841_v35 = vrot.slane %v1836_v34, 2  ;;  %v3563_v36 = vpop.f32.mrb[21].mxu0 }
 0xc7f   :  { %v1898_v10 = vld [vmem:[#allocation14 + $0x8] sm:$0x3] }
 0xc80   :  { %v1843_v38 = vadd.f32 %v1841_v35, %v1698_v37 }
 0xc82   :  { %4001 = vtanh.f32 %v1843_v38  ;;  %v3185_v42 = vmul.f32 -1.442695, %v1843_v38 }
 0xc83   :  { %4003 = vpow2.f32 %v3184_v41 }
 0xc84   :  { %4005 = vpow2.f32 %v3185_v42 }
 0xc87   :  { %v4000_v39 = vpop.eup %3999 }
 0xc88   :  { %1856 = vrot.lane.b32.xlu0 %v4000_v39, %s4240_s2 }
 0xc8c   :  { %v4002_v40 = vpop.eup %4001 }
 0xc8d   :  { %1883 = vrot.lane.b32.xlu1 %v4002_v40, %s4240_s2  ;;  %v4004_v43 = vpop.eup %4003 }
 0xc8e   :  { %v1847_v44 = vadd.f32 1.0, %v4004_v43  ;;  %v4006_v45 = vpop.eup %4005 }
 0xc8f   :  { %v1874_v46 = vadd.f32 1.0, %v4006_v45 }
 0xc90   :  { %4007 = vrcp.f32 %v1847_v44 }
 0xc91   :  { %4009 = vrcp.f32 %v1874_v46 }
 0xc9a   :  { %v4008_v47 = vpop.eup %4007 }
 0xc9b   :  { %v4010_v50 = vpop.eup %4009  ;;  %v1854_v54 = vmul.f32 %v4008_v47, %v1852_v53 }
 0xc9c   :  { %v1881_v58 = vmul.f32 %v4010_v50, %v1879_v57 }
 0xcfa   :  { %v1857_v48 = vpop.permute.xlu0 %1856 }
 0xcfb   :  { %v1859_v49 = vmul.f32 %v4008_v47, %v1857_v48 }
 0xcfd   :  { %1861 = vrot.lane.b32.xlu0 %v1859_v49, %s4241_s9 }
 0xcff   :  { %v1884_v51 = vpop.permute.xlu1 %1883 }
 0xd00   :  { %v1886_v52 = vmul.f32 %v4010_v50, %v1884_v51 }
 0xd02   :  { %1888 = vrot.lane.b32.xlu1 %v1886_v52, %s4241_s9 }
 0xd6f   :  { %v1862_v55 = vpop.permute.xlu0 %1861 }
 0xd70   :  { %v4609_v56 = vadd.f32 %v1862_v55, %v1854_v54 }
 0xd72   :  { %4011 = vtanh.f32 %v4609_v56  ;;  %v2213_v48 = vrot.slane %v4609_v56, 6 }
 0xd74   :  { %v1889_v59 = vpop.permute.xlu1 %1888 }
 0xd75   :  { %v4613_v60 = vadd.f32 %v1889_v59, %v1881_v58 }
 0xd77   :  { %4013 = vtanh.f32 %v4613_v60  ;;  %v2240_v52 = vrot.slane %v4613_v60, 2 }
 0xd7c   :  { %v4012_v61 = vpop.eup %4011 }
 0xd7d   :  { %1867 = vrot.lane.b32.xlu0 %v4012_v61, %s4240_s2 }
 0xd81   :  { %v4014_v63 = vpop.eup %4013 }
 0xd82   :  { %1894 = vrot.lane.b32.xlu1 %v4014_v63, %s4240_s2 }
 0xdef   :  { %v1868_v62 = vpop.permute.xlu0 %1867 }
 0xdf0   :  { %v1870_v2 = vmul.f32 %v4008_v47, %v1868_v62 }
 0xdf2   :  { %1900 = vrot.lane.b32.xlu0 %v1870_v2, %s4241_s9 }
 0xdf4   :  { %v1895_v3 = vpop.permute.xlu1 %1894 }
 0xdf5   :  { %v1897_v4 = vmul.f32 %v4010_v50, %v1895_v3 }
 0xdf7   :  { %v1978_v7 = vrot.slane %v1897_v4, 6  ;;  %v2259_v4 = vld [vmem:[#allocation14 + $0xa] sm:$0x3] }
 0xdf9   :  { %1979 = vrot.lane.b32.xlu1 %v1978_v7, %s4241_s9 }
 0xe64   :  { %v1901_v8 = vpop.permute.xlu0 %1900 }
 0xe65   :  { %3573 = vmatmul.mubr.msk.f32.vlgmr.msra.gmra.mrb[18].mxu1 %vm134_vm1, %v1901_v8 }
 0xe66   :  { %3848 = vmatpush3.bf16.msra.mxu1 %v4380_v16  ;;  %3594 = vmatprep.mubr.msk.f32.mxu1 %vm4239_vm0, %v4237_v0 }
 0xe67   :  { %3849 = vmatprep.subr.bf16.mxu1 %v4238_v1 }
 0xe6a   :  { %3851 = vmatpush3.bf16.msra.mxu1 %v4383_v21 }
 0xe6b   :  { %v1980_v5 = vpop.permute.xlu1 %1979  ;;  %3858 = vmatprep.subr.bf16.mxu1 %v4238_v1 }
 0xe6c   :  { %3584 = vmatmul.mubr.msk.f32.vlgmr.msra.gmra.mrb[22].mxu0 %vm134_vm1, %v1980_v5 }
 0xe6d   :  { %3595 = vmatmul.mubr.msk.f32.vlgmr.msra.gmra.mrb[20].mxu1 %vm134_vm1, %v1901_v8  ;;  %3854 = vmatpush3.bf16.msra.mxu0 %v4386_v23 }
 0xe6e   :  { %3855 = vmatprep.subr.bf16.mxu0 %v4238_v1  ;;  %3605 = vmatprep.mubr.msk.f32.mxu0 %vm4239_vm0, %v4237_v0 }
 0xe6f   :  { %3860 = vmatpush3.bf16.msra.mxu1 %v4421_v13  ;;  %3616 = vmatprep.mubr.msk.f32.mxu1 %vm4239_vm0, %v4237_v0 }
 0xe70   :  { %3861 = vmatprep.subr.bf16.mxu1 %v4238_v1 }
 0xe71   :  { %3857 = vmatpush3.bf16.msra.mxu0 %v4394_v27 }
 0xe72   :  { %3864 = vmatprep.subr.bf16.mxu0 %v4238_v1 }
 0xe73   :  { %3863 = vmatpush3.bf16.msra.mxu1 %v4426_v20 }
 0xe74   :  { %3606 = vmatmul.mubr.msk.f32.vlgmr.msra.gmra.mrb[24].mxu0 %vm134_vm1, %v1980_v5  ;;  %3870 = vmatprep.subr.bf16.mxu1 %v4238_v1 }
 0xe75   :  { %3866 = vmatpush3.bf16.msra.mxu0 %v4423_v18  ;;  %3627 = vmatprep.mubr.msk.f32.mxu0 %vm4239_vm0, %v4237_v0 }
 0xe76   :  { %3867 = vmatprep.subr.bf16.mxu0 %v4238_v1 }
 0xe79   :  { %3869 = vmatpush3.bf16.msra.mxu0 %v4435_v26 }
 0xe7a   :  { %3876 = vmatprep.subr.bf16.mxu0 %v4238_v1 }
 0xf38   :  { %v1970_v14 = vpop.f32.mrb[18].mxu1 }
 0xf39   :  { %v1974_v15 = vadd.f32 %v1970_v14, %v1898_v10  ;;  %v3574_v12 = vpop.f32.mrb[19].mxu1  ;;  %v2338_v10 = vld [vmem:[#allocation14 + $0x4] sm:$0x3] }
 0xf3b   :  { %1975 = vst [vmem:[#allocation14 + $0x8] sm:$0x3] %v1974_v15 }
 0xf3f   :  { %v2049_v19 = vpop.f32.mrb[22].mxu0 }
 0xf40   :  { %v2053_v22 = vadd.f32 %v2049_v19, %v1976_v11  ;;  %v2123_v6 = vpop.f32.mrb[20].mxu1  ;;  %v3585_v24 = vpop.f32.mrb[23].mxu0 }
 0xf41   :  { %v2128_v17 = vrot.slane %v2123_v6, 6  ;;  %v3596_v25 = vpop.f32.mrb[21].mxu1  ;;  %v2417_v6 = vld [vmem:[#allocation2 + $0x10] sm:$0x30] }
 0xf42   :  { %2054 = vst [vmem:[#allocation14 + $0x6] sm:$0x3] %v2053_v22 }
 0xf43   :  { %v2130_v29 = vadd.f32 %v2128_v17, %v2055_v28 }
 0xf45   :  { %4015 = vtanh.f32 %v2130_v29  ;;  %v3190_v36 = vmul.f32 -1.442695, %v2130_v29  ;;  %v2418_v29 = vld [vmem:[#allocation2 + $0x8] sm:$0xc] }
 0xf47   :  { %v2197_v9 = vpop.f32.mrb[24].mxu0 }
 0xf48   :  { %v2202_v30 = vrot.slane %v2197_v9, 4  ;;  %v3607_v31 = vpop.f32.mrb[25].mxu0 }
 0xf4a   :  { %v2204_v33 = vadd.f32 %v2202_v30, %v2056_v32 }
 0xf4c   :  { %4017 = vtanh.f32 %v2204_v33  ;;  %v3191_v37 = vmul.f32 -1.442695, %v2204_v33 }
 0xf4d   :  { %4019 = vpow2.f32 %v3190_v36 }
 0xf4e   :  { %4021 = vpow2.f32 %v3191_v37 }
 0xf4f   :  { %v4016_v34 = vpop.eup %4015 }
 0xf50   :  { %2217 = vrot.lane.b32.xlu0 %v4016_v34, %s4240_s2 }
 0xf56   :  { %v4018_v35 = vpop.eup %4017 }
 0xf57   :  { %2244 = vrot.lane.b32.xlu1 %v4018_v35, %s4240_s2  ;;  %v4020_v38 = vpop.eup %4019 }
 0xf58   :  { %v2208_v39 = vadd.f32 1.0, %v4020_v38  ;;  %v4022_v40 = vpop.eup %4021 }
 0xf59   :  { %v2235_v41 = vadd.f32 1.0, %v4022_v40 }
 0xf5a   :  { %4023 = vrcp.f32 %v2208_v39 }
 0xf5b   :  { %4025 = vrcp.f32 %v2235_v41 }
 0xf64   :  { %v4024_v42 = vpop.eup %4023 }
 0xf65   :  { %v4026_v45 = vpop.eup %4025  ;;  %v2215_v49 = vmul.f32 %v4024_v42, %v2213_v48 }
 0xf66   :  { %v2242_v53 = vmul.f32 %v4026_v45, %v2240_v52 }
 0xfc2   :  { %v2218_v43 = vpop.permute.xlu0 %2217 }
 0xfc3   :  { %v2220_v44 = vmul.f32 %v4024_v42, %v2218_v43 }
 0xfc5   :  { %2222 = vrot.lane.b32.xlu0 %v2220_v44, %s4241_s9 }
 0xfc9   :  { %v2245_v46 = vpop.permute.xlu1 %2244 }
 0xfca   :  { %v2247_v47 = vmul.f32 %v4026_v45, %v2245_v46 }
 0xfcc   :  { %2249 = vrot.lane.b32.xlu1 %v2247_v47, %s4241_s9 }
0x1037   :  { %v2223_v50 = vpop.permute.xlu0 %2222 }
0x1038   :  { %v4653_v51 = vadd.f32 %v2223_v50, %v2215_v49 }
0x103a   :  { %4027 = vtanh.f32 %v4653_v51  ;;  %v2575_v44 = vrot.slane %v4653_v51, 6 }
0x103e   :  { %v2250_v54 = vpop.permute.xlu1 %2249 }
0x103f   :  { %v4657_v55 = vadd.f32 %v2250_v54, %v2242_v53 }
0x1041   :  { %4029 = vtanh.f32 %v4657_v55  ;;  %v2602_v48 = vrot.slane %v4657_v55, 2 }
0x1044   :  { %v4028_v57 = vpop.eup %4027 }
0x1045   :  { %2228 = vrot.lane.b32.xlu0 %v4028_v57, %s4240_s2 }
0x104b   :  { %v4030_v58 = vpop.eup %4029 }
0x104c   :  { %2255 = vrot.lane.b32.xlu1 %v4030_v58, %s4240_s2 }
0x10b7   :  { %v2229_v56 = vpop.permute.xlu0 %2228 }
0x10b8   :  { %v2231_v59 = vmul.f32 %v4024_v42, %v2229_v56 }
0x10ba   :  { %v2261_v61 = vrot.slane %v2231_v59, 2 }
0x10bc   :  { %2262 = vrot.lane.b32.xlu0 %v2261_v61, %s4241_s9 }
0x10be   :  { %v2256_v63 = vpop.permute.xlu1 %2255 }
0x10bf   :  { %v2258_v62 = vmul.f32 %v4026_v45, %v2256_v63 }
0x10c1   :  { %v2340_v60 = vrot.slane %v2258_v62, 4 }
0x10c3   :  { %2341 = vrot.lane.b32.xlu1 %v2340_v60, %s4241_s9 }
0x112e   :  { %v2263_v2 = vpop.permute.xlu0 %2262 }
0x112f   :  { %3617 = vmatmul.mubr.msk.f32.vlgmr.msra.gmra.mrb[22].mxu1 %vm134_vm1, %v2263_v2 }
0x1130   :  { %3872 = vmatpush3.bf16.msra.mxu1 %v4380_v16  ;;  %3638 = vmatprep.mubr.msk.f32.mxu1 %vm4239_vm0, %v4237_v0 }
0x1131   :  { %3873 = vmatprep.subr.bf16.mxu1 %v4238_v1 }
0x1134   :  { %3875 = vmatpush3.bf16.msra.mxu1 %v4383_v21 }
0x1135   :  { %v2342_v3 = vpop.permute.xlu1 %2341  ;;  %3882 = vmatprep.subr.bf16.mxu1 %v4238_v1 }
0x1136   :  { %3628 = vmatmul.mubr.msk.f32.vlgmr.msra.gmra.mrb[26].mxu0 %vm134_vm1, %v2342_v3 }
0x1137   :  { %3639 = vmatmul.mubr.msk.f32.vlgmr.msra.gmra.mrb[24].mxu1 %vm134_vm1, %v2263_v2  ;;  %3878 = vmatpush3.bf16.msra.mxu0 %v4386_v23 }
0x1138   :  { %3879 = vmatprep.subr.bf16.mxu0 %v4238_v1  ;;  %3649 = vmatprep.mubr.msk.f32.mxu0 %vm4239_vm0, %v4237_v0 }
0x1139   :  { %3884 = vmatpush3.bf16.msra.mxu1 %v4421_v13  ;;  %3660 = vmatprep.mubr.msk.f32.mxu1 %vm4239_vm0, %v4237_v0 }
0x113a   :  { %3885 = vmatprep.subr.bf16.mxu1 %v4238_v1 }
0x113b   :  { %3881 = vmatpush3.bf16.msra.mxu0 %v4394_v27 }
0x113c   :  { %3888 = vmatprep.subr.bf16.mxu0 %v4238_v1 }
0x113d   :  { %3887 = vmatpush3.bf16.msra.mxu1 %v4426_v20 }
0x113e   :  { %3650 = vmatmul.mubr.msk.f32.vlgmr.msra.gmra.mrb[28].mxu0 %vm134_vm1, %v2342_v3  ;;  %3894 = vmatprep.subr.bf16.mxu1 %v4238_v1 }
0x113f   :  { %3890 = vmatpush3.bf16.msra.mxu0 %v4423_v18  ;;  %3671 = vmatprep.mubr.msk.f32.mxu0 %vm4239_vm0, %v4237_v0 }
0x1140   :  { %3891 = vmatprep.subr.bf16.mxu0 %v4238_v1 }
0x1143   :  { %3893 = vmatpush3.bf16.msra.mxu0 %v4435_v26 }
0x1144   :  { %3900 = vmatprep.subr.bf16.mxu0 %v4238_v1 }
0x1202   :  { %v2332_v7 = vpop.f32.mrb[22].mxu1 }
0x1203   :  { %v2336_v8 = vadd.f32 %v2332_v7, %v2259_v4  ;;  %v3618_v5 = vpop.f32.mrb[23].mxu1 }
0x1205   :  { %2337 = vst [vmem:[#allocation14 + $0xa] sm:$0x3] %v2336_v8 }
0x1209   :  { %v2411_v14 = vpop.f32.mrb[26].mxu0 }
0x120a   :  { %v2415_v15 = vadd.f32 %v2411_v14, %v2338_v10  ;;  %v2485_v12 = vpop.f32.mrb[24].mxu1  ;;  %v3629_v11 = vpop.f32.mrb[27].mxu0 }
0x120b   :  { %v2490_v19 = vrot.slane %v2485_v12, 4  ;;  %v3640_v22 = vpop.f32.mrb[25].mxu1 }
0x120c   :  { %2416 = vst [vmem:[#allocation14 + $0x4] sm:$0x3] %v2415_v15 }
0x120d   :  { %v2492_v24 = vadd.f32 %v2490_v19, %v2417_v6 }
0x120f   :  { %4031 = vtanh.f32 %v2492_v24  ;;  %v3196_v32 = vmul.f32 -1.442695, %v2492_v24 }
0x1211   :  { %v2559_v17 = vpop.f32.mrb[28].mxu0 }
0x1212   :  { %v2564_v25 = vrot.slane %v2559_v17, 6  ;;  %v3651_v28 = vpop.f32.mrb[29].mxu0 }
0x1214   :  { %v2566_v9 = vadd.f32 %v2564_v25, %v2418_v29 }
0x1216   :  { %4033 = vtanh.f32 %v2566_v9  ;;  %v3197_v33 = vmul.f32 -1.442695, %v2566_v9 }
0x1217   :  { %4035 = vpow2.f32 %v3196_v32 }
0x1218   :  { %4037 = vpow2.f32 %v3197_v33 }
0x1219   :  { %v4032_v30 = vpop.eup %4031 }
0x121a   :  { %2579 = vrot.lane.b32.xlu0 %v4032_v30, %s4240_s2 }
0x1220   :  { %v4034_v31 = vpop.eup %4033 }
0x1221   :  { %2606 = vrot.lane.b32.xlu1 %v4034_v31, %s4240_s2  ;;  %v4036_v34 = vpop.eup %4035 }
0x1222   :  { %v2570_v35 = vadd.f32 1.0, %v4036_v34  ;;  %v4038_v36 = vpop.eup %4037 }
0x1223   :  { %v2597_v37 = vadd.f32 1.0, %v4038_v36 }
0x1224   :  { %4039 = vrcp.f32 %v2570_v35 }
0x1225   :  { %4041 = vrcp.f32 %v2597_v37 }
0x122e   :  { %v4040_v38 = vpop.eup %4039 }
0x122f   :  { %v4042_v41 = vpop.eup %4041  ;;  %v2577_v45 = vmul.f32 %v4040_v38, %v2575_v44 }
0x1230   :  { %v2604_v49 = vmul.f32 %v4042_v41, %v2602_v48 }
0x128c   :  { %v2580_v39 = vpop.permute.xlu0 %2579 }
0x128d   :  { %v2582_v40 = vmul.f32 %v4040_v38, %v2580_v39 }
0x128f   :  { %2584 = vrot.lane.b32.xlu0 %v2582_v40, %s4241_s9 }
0x1293   :  { %v2607_v42 = vpop.permute.xlu1 %2606 }
0x1294   :  { %v2609_v43 = vmul.f32 %v4042_v41, %v2607_v42 }
0x1296   :  { %2611 = vrot.lane.b32.xlu1 %v2609_v43, %s4241_s9 }
0x1301   :  { %v2585_v46 = vpop.permute.xlu0 %2584 }
0x1302   :  { %v4697_v47 = vadd.f32 %v2585_v46, %v2577_v45  ;;  %v2980_v46 = vld [vmem:[#allocation14 + $0xe] sm:$0x3] }
0x1304   :  { %4043 = vtanh.f32 %v4697_v47  ;;  %v2934_v9 = vrot.slane %v4697_v47, 6 }
0x1308   :  { %v2612_v50 = vpop.permute.xlu1 %2611 }
0x1309   :  { %v4701_v52 = vadd.f32 %v2612_v50, %v2604_v49  ;;  %v3059_v50 = vld [vmem:[#allocation14] sm:$0x3] }
0x130b   :  { %4045 = vtanh.f32 %v4701_v52  ;;  %v2961_v33 = vrot.slane %v4701_v52, 2 }
0x130e   :  { %v4044_v53 = vpop.eup %4043 }
0x130f   :  { %2590 = vrot.lane.b32.xlu0 %v4044_v53, %s4240_s2 }
0x1315   :  { %v4046_v54 = vpop.eup %4045 }
0x1316   :  { %2617 = vrot.lane.b32.xlu1 %v4046_v54, %s4240_s2 }
0x1381   :  { %v2591_v51 = vpop.permute.xlu0 %2590 }
0x1382   :  { %v2593_v57 = vmul.f32 %v4040_v38, %v2591_v51 }
0x1384   :  { %v2623_v58 = vrot.slane %v2593_v57, 4 }
0x1386   :  { %2624 = vrot.lane.b32.xlu0 %v2623_v58, %s4241_s9 }
0x1388   :  { %v2618_v56 = vpop.permute.xlu1 %2617 }
0x1389   :  { %v2620_v59 = vmul.f32 %v4042_v41, %v2618_v56 }
0x138b   :  { %v2702_v55 = vrot.slane %v2620_v59, 2 }
0x138d   :  { %2703 = vrot.lane.b32.xlu1 %v2702_v55, %s4241_s9 }
0x13f8   :  { %v2625_v61 = vpop.permute.xlu0 %2624 }
0x13f9   :  { %3661 = vmatmul.mubr.msk.f32.vlgmr.msra.gmra.mrb[26].mxu1 %vm134_vm1, %v2625_v61 }
0x13fa   :  { %3896 = vmatpush3.bf16.msra.mxu1 %v4380_v16  ;;  %3682 = vmatprep.mubr.msk.f32.mxu1 %vm4239_vm0, %v4237_v0  ;;  %v2621_v16 = vld [vmem:[#allocation14 + $0xc] sm:$0x3] }
0x13fb   :  { %3897 = vmatprep.subr.bf16.mxu1 %v4238_v1 }
0x13fe   :  { %3899 = vmatpush3.bf16.msra.mxu1 %v4383_v21 }
0x13ff   :  { %v2704_v63 = vpop.permute.xlu1 %2703  ;;  %3906 = vmatprep.subr.bf16.mxu1 %v4238_v1 }
0x1400   :  { %3672 = vmatmul.mubr.msk.f32.vlgmr.msra.gmra.mrb[30].mxu0 %vm134_vm1, %v2704_v63 }
0x1401   :  { %3683 = vmatmul.mubr.msk.f32.vlgmr.msra.gmra.mrb[28].mxu1 %vm134_vm1, %v2625_v61  ;;  %3902 = vmatpush3.bf16.msra.mxu0 %v4386_v23 }
0x1402   :  { %3903 = vmatprep.subr.bf16.mxu0 %v4238_v1  ;;  %3693 = vmatprep.mubr.msk.f32.mxu0 %vm4239_vm0, %v4237_v0 }
0x1403   :  { %3908 = vmatpush3.bf16.msra.mxu1 %v4421_v13  ;;  %3704 = vmatprep.mubr.msk.f32.mxu1 %vm4239_vm0, %v4237_v0 }
0x1404   :  { %3909 = vmatprep.subr.bf16.mxu1 %v4238_v1 }
0x1405   :  { %3905 = vmatpush3.bf16.msra.mxu0 %v4394_v27  ;;  %v2700_v27 = vld [vmem:[#allocation14 + $0x2] sm:$0x3] }
0x1406   :  { %3912 = vmatprep.subr.bf16.mxu0 %v4238_v1 }
0x1407   :  { %3911 = vmatpush3.bf16.msra.mxu1 %v4426_v20 }
0x1408   :  { %3694 = vmatmul.mubr.msk.f32.vlgmr.msra.gmra.mrb[32].mxu0 %vm134_vm1, %v2704_v63 }
0x1409   :  { %3914 = vmatpush3.bf16.msra.mxu0 %v4423_v18  ;;  %3715 = vmatprep.mubr.msk.f32.mxu0 %vm4239_vm0, %v4237_v0  ;;  %v2779_v18 = vld [vmem:[#allocation2 + $0x10] sm:$0xc0]  ;;  %v2780_v0 = vld [vmem:[#allocation2 + $0x8] sm:$0x3] }
0x140a   :  { %3915 = vmatprep.subr.bf16.mxu0 %v4238_v1 }
0x140d   :  { %3917 = vmatpush3.bf16.msra.mxu0 %v4435_v26 }
0x14cc   :  { %v2694_v21 = vpop.f32.mrb[26].mxu1 }
0x14cd   :  { %v2698_v23 = vadd.f32 %v2694_v21, %v2621_v16  ;;  %v3662_v13 = vpop.f32.mrb[27].mxu1 }
0x14cf   :  { %2699 = vst [vmem:[#allocation14 + $0xc] sm:$0x3] %v2698_v23 }
0x14d3   :  { %v2773_v62 = vpop.f32.mrb[30].mxu0 }
0x14d4   :  { %v2777_v60 = vadd.f32 %v2773_v62, %v2700_v27  ;;  %v2847_v20 = vpop.f32.mrb[28].mxu1  ;;  %v3673_v2 = vpop.f32.mrb[31].mxu0 }
0x14d5   :  { %v2852_v3 = vrot.slane %v2847_v20, 2  ;;  %v3684_v4 = vpop.f32.mrb[29].mxu1 }
0x14d6   :  { %2778 = vst [vmem:[#allocation14 + $0x2] sm:$0x3] %v2777_v60 }
0x14d7   :  { %v2854_v7 = vadd.f32 %v2852_v3, %v2779_v18 }
0x14d9   :  { %4047 = vtanh.f32 %v2854_v7  ;;  %v3202_v14 = vmul.f32 -1.442695, %v2854_v7 }
0x14db   :  { %v2921_v1 = vpop.f32.mrb[32].mxu0 }
0x14dc   :  { %v2925_v8 = vadd.f32 %v2921_v1, %v2780_v0  ;;  %v3695_v26 = vpop.f32.mrb[33].mxu0 }
0x14de   :  { %4049 = vtanh.f32 %v2925_v8  ;;  %v3203_v15 = vmul.f32 -1.442695, %v2925_v8 }
0x14df   :  { %4051 = vpow2.f32 %v3202_v14 }
0x14e0   :  { %4053 = vpow2.f32 %v3203_v15 }
0x14e3   :  { %v4048_v5 = vpop.eup %4047 }
0x14e4   :  { %2938 = vrot.lane.b32.xlu0 %v4048_v5, %s4240_s2 }
0x14e8   :  { %v4050_v10 = vpop.eup %4049 }
0x14e9   :  { %2965 = vrot.lane.b32.xlu1 %v4050_v10, %s4240_s2  ;;  %v4052_v12 = vpop.eup %4051 }
0x14ea   :  { %v2929_v11 = vadd.f32 1.0, %v4052_v12  ;;  %v4054_v19 = vpop.eup %4053 }
0x14eb   :  { %v2956_v22 = vadd.f32 1.0, %v4054_v19 }
0x14ec   :  { %4055 = vrcp.f32 %v2929_v11 }
0x14ed   :  { %4057 = vrcp.f32 %v2956_v22 }
0x14f6   :  { %v4056_v6 = vpop.eup %4055 }
0x14f7   :  { %v4058_v25 = vpop.eup %4057  ;;  %v2936_v30 = vmul.f32 %v4056_v6, %v2934_v9 }
0x14f8   :  { %v2963_v34 = vmul.f32 %v4058_v25, %v2961_v33 }
0x1556   :  { %v2939_v24 = vpop.permute.xlu0 %2938 }
0x1557   :  { %v2941_v17 = vmul.f32 %v4056_v6, %v2939_v24 }
0x1559   :  { %2943 = vrot.lane.b32.xlu0 %v2941_v17, %s4241_s9 }
0x155b   :  { %v2966_v28 = vpop.permute.xlu1 %2965 }
0x155c   :  { %v2968_v29 = vmul.f32 %v4058_v25, %v2966_v28 }
0x155e   :  { %2970 = vrot.lane.b32.xlu1 %v2968_v29, %s4241_s9 }
0x15cb   :  { %v2944_v31 = vpop.permute.xlu0 %2943 }
0x15cc   :  { %v2946_v32 = vadd.f32 %v2944_v31, %v2936_v30 }
0x15ce   :  { %4059 = vtanh.f32 %v2946_v32 }
0x15d0   :  { %v2971_v35 = vpop.permute.xlu1 %2970 }
0x15d1   :  { %v2973_v36 = vadd.f32 %v2971_v35, %v2963_v34 }
0x15d3   :  { %4061 = vtanh.f32 %v2973_v36 }
0x15d8   :  { %v4060_v37 = vpop.eup %4059 }
0x15d9   :  { %2949 = vrot.lane.b32.xlu0 %v4060_v37, %s4240_s2 }
0x15dd   :  { %v4062_v38 = vpop.eup %4061 }
0x15de   :  { %2976 = vrot.lane.b32.xlu1 %v4062_v38, %s4240_s2 }
0x164b   :  { %v2950_v39 = vpop.permute.xlu0 %2949 }
0x164c   :  { %v2952_v40 = vmul.f32 %v4056_v6, %v2950_v39 }
0x164e   :  { %v2982_v41 = vrot.slane %v2952_v40, 6 }
0x1650   :  { %v2977_v42 = vpop.permute.xlu1 %2976  ;;  %2983 = vrot.lane.b32.xlu0 %v2982_v41, %s4241_s9 }
0x1651   :  { %v2979_v43 = vmul.f32 %v4058_v25, %v2977_v42 }
0x1653   :  { %3061 = vrot.lane.b32.xlu1 %v2979_v43, %s4241_s9 }
0x16c2   :  { %v2984_v44 = vpop.permute.xlu0 %2983 }
0x16c3   :  { %3705 = vmatmul.mubr.msk.f32.vlgmr.msra.gmra.mrb[30].mxu1 %vm134_vm1, %v2984_v44 }
0x16c5   :  { %v3062_v45 = vpop.permute.xlu1 %3061 }
0x16c6   :  { %3716 = vmatmul.mubr.msk.f32.vlgmr.msra.gmra.mrb[34].mxu0 %vm134_vm1, %v3062_v45 }
0x1796   :  { %v3053_v47 = vpop.f32.mrb[30].mxu1 }
0x1797   :  { %v3057_v48 = vadd.f32 %v3053_v47, %v2980_v46  ;;  %v3706_v49 = vpop.f32.mrb[31].mxu1 }
0x1799   :  { %3058 = vst [vmem:[#allocation14 + $0xe] sm:$0x3] %v3057_v48  ;;  %v3131_v52 = vpop.f32.mrb[34].mxu0 }
0x179a   :  { %v3135_v53 = vadd.f32 %v3131_v52, %v3059_v50  ;;  %v3717_v54 = vpop.f32.mrb[35].mxu0 }
0x179c   :  { %3136 = vst [vmem:[#allocation14] sm:$0x3] %v3135_v53 }
0x179d   :  { %4206 = shalt.err (!%p4203_p10)
}
0x179e   :  { %s4207_s16 = scalar_lea.hbm %s4768_s8, 256 }
0x179f   :  { %p4208_p11 = scmp.ne.s32.totalorder %s4768_s8, %s4207_s16  ;;  %p4211_p12 = scmp.lt.u32.totalorder %s4207_s16, %s4768_s8 }
0x17a1   :  { %p4213_p13 = pnand %p4211_p12, %p4208_p11 }
0x17a3   :  { %4216 = shalt.err (!%p4213_p13)
}
0x17a4   :  { %s4243_s3 = smov 2  }
0x17a5   :  { %3148 = dma.vmem_to_hbm [thread:$0]  %s3143_s12, 256, %s4768_s8, [#allocation5], %s4241_s9, %s4241_s9, %s4243_s3  }
0x17a6   :  { %4225 = dma.done.wait [#allocation5], 256  }
0x17a7   :  { %4226 = vsyncadd [#allocation5], 4294967040 }
0x17a8   :  { %3152 = vsyncpa [#allocation4], 1 }
0x17a9   :  { %3153 = vsyncpa [#allocation7], 1 }
0x17aa   :  { %3154 = vsyncpa [#allocation10], 1 }
0x17ab   :  { %3155 = vsyncpa [#allocation13], 1 }
0x17ac   :  { %3156 = vsyncpa [#allocation5], 1 }

</bundles_post_ra>
